<compile_context>
chip_gen: v5e
topology: v5e:2x2
jax: 0.10.0
libtpu: 0.0.40
codegen_flags: <defaults>
</compile_context>

<pallas_src>
import functools

import jax
import jax.numpy as jnp
from jax.experimental import pallas as pl
from jax.experimental.pallas import tpu as pltpu


def _aux_head_kernel(x_ref, w1_ref, b1_ref, w2_ref, b2_ref, w3_ref, b3_ref, out_ref):
    # x_ref block: (B, 4*kk*C) f32, flattened as (pooled_pos, window_elem, channel)
    x = jnp.maximum(x_ref[...], 0.0)                                  # ReLU (f32, VPU)

    # AvgPool(k) + Conv1x1 + BN1 scale  ==  one block-diagonal matmul -> (B, 4*128)
    h1 = jnp.dot(x.astype(jnp.bfloat16), w1_ref[...],
                 preferred_element_type=jnp.float32)
    h1 = jnp.maximum(h1 + b1_ref[...], 0.0)                           # BN1 bias + ReLU

    # 2x2 conv on the 2x2 pooled map (1x1 output) + BN2 scale == one (512,768) matmul
    y2 = jnp.dot(h1.astype(jnp.bfloat16), w2_ref[...],
                 preferred_element_type=jnp.float32)                  # (B, 768)
    y2 = jnp.maximum(y2 + b2_ref[...], 0.0)                           # BN2 bias + ReLU

    # classifier, zero-padded to a lane-dense 128-wide output
    out = jnp.dot(y2.astype(jnp.bfloat16), w3_ref[...],
                  preferred_element_type=jnp.float32) + b3_ref[...]   # (B, 128)
    out_ref[...] = out.astype(out_ref.dtype)


def auxiliary_head_forward(x, packed, *, k, num_classes, batch_block=None):
    """x: NCHW float32 (N, C, 2k, 2k). packed: output of pack_params."""
    N, C, H, W = x.shape
    assert H == 2 * k and W == 2 * k, "AuxiliaryHead expects (2k)x(2k) spatial input"
    w1, b1, w2, b2, w3, b3 = packed
    kk = k * k
    feat_in = 4 * kk * C
    assert w1.shape[0] == feat_in
    out_w = w3.shape[1]                                   # 128-padded class width

    # glue: repack NCHW -> (N, 4*kk*C); flatten (pooled pos, window elem, channel)
    xp = jnp.transpose(x, (0, 2, 3, 1))                                   # NHWC
    xp = xp.reshape(N, 2, k, 2, k, C).transpose(0, 1, 3, 2, 4, 5)         # (N,pr,pc,wr,wc,C)
    xp = xp.reshape(N, feat_in)

    # batch tiling: B samples per grid step (amortizes step overhead, fills MXU rows)
    if batch_block is None:
        batch_block = 256 if N >= 256 else max(8, ((N + 7) // 8) * 8)
    B = batch_block
    n_pad = ((N + B - 1) // B) * B
    if n_pad != N:
        xp = jnp.pad(xp, ((0, n_pad - N), (0, 0)))

    grid_spec = pltpu.PrefetchScalarGridSpec(
        num_scalar_prefetch=0,
        grid=(n_pad // B,),
        in_specs=[
            pl.BlockSpec((B, feat_in), lambda n: (n, 0)),
            pl.BlockSpec(w1.shape, lambda n: (0, 0)),     # weights: constant index map
            pl.BlockSpec(b1.shape, lambda n: (0, 0)),     #   -> VMEM-resident across steps
            pl.BlockSpec(w2.shape, lambda n: (0, 0)),
            pl.BlockSpec(b2.shape, lambda n: (0, 0)),
            pl.BlockSpec(w3.shape, lambda n: (0, 0)),
            pl.BlockSpec(b3.shape, lambda n: (0, 0)),
        ],
        out_specs=pl.BlockSpec((B, out_w), lambda n: (n, 0)),
    )

    out = pl.pallas_call(
        _aux_head_kernel,
        out_shape=jax.ShapeDtypeStruct((n_pad, out_w), x.dtype),
        grid_spec=grid_spec,
        compiler_params=pltpu.CompilerParams(dimension_semantics=("parallel",)),
    )(xp, w1, b1, w2, b2, w3, b3)
    return out[:N, :num_classes]


def init_params(key, C, num_classes):
    """Deterministic synthetic parameters in PyTorch layout (eval-mode BN stats)."""
    ks = jax.random.split(key, 12)
    conv1_w = jax.random.normal(ks[0], (128, C, 1, 1), jnp.float32) * 0.1     # (O, I, 1, 1)
    conv2_w = jax.random.normal(ks[1], (768, 128, 2, 2), jnp.float32) * 0.05  # (O, I, 2, 2)
    fc_w = jax.random.normal(ks[2], (num_classes, 768), jnp.float32) * 0.05   # (out, in)
    fc_b = jax.random.normal(ks[3], (num_classes,), jnp.float32) * 0.1

    def bn_params(kg, kb, km, kv, n):                     # (gamma, beta, running_mean, running_var)
        gamma = 1.0 + 0.1 * jax.random.normal(kg, (n,), jnp.float32)
        beta = 0.1 * jax.random.normal(kb, (n,), jnp.float32)
        mean = 0.1 * jax.random.normal(km, (n,), jnp.float32)
        var = 1.0 + 0.1 * jax.random.uniform(kv, (n,), jnp.float32)
        return (gamma, beta, mean, var)

    bn1 = bn_params(ks[4], ks[5], ks[6], ks[7], 128)
    bn2 = bn_params(ks[8], ks[9], ks[10], ks[11], 768)
    return (conv1_w, bn1, conv2_w, bn2, fc_w, fc_b)


def pack_params(params, *, k):
    """Fold pool/BN into matmul weights in the kernel's lane-dense layout."""
    eps = 1e-5
    conv1_w, bn1, conv2_w, bn2, fc_w, fc_b = params
    kk = k * k
    num_classes = fc_w.shape[0]

    def bn_fold(bn):
        gamma, beta, mean, var = bn
        scale = gamma / jnp.sqrt(var + eps)
        bias = beta - mean * scale
        return scale, bias

    s1, b1 = bn_fold(bn1)                                               # (128,)
    s2, b2 = bn_fold(bn2)                                               # (768,)

    # AvgPool(k) + Conv1x1 + BN1 scale per pooled position: (kk*C, 128), then
    # block-diagonal across the 4 pooled positions -> (4*kk*C, 4*128).
    w1 = conv1_w[:, :, 0, 0].T                                          # (C, 128)
    w1_pos = jnp.tile(w1, (kk, 1)) / float(kk) * s1[None, :]            # (kk*C, 128)
    w1_bd = jnp.kron(jnp.eye(4, dtype=jnp.float32), w1_pos)             # (4*kk*C, 512)
    b1_t = jnp.tile(b1, (4,)).reshape(1, 512)

    # 2x2 conv on the 2x2 pooled map == one (512, 768) matmul; fold BN2 scale.
    w2_flat = jnp.transpose(conv2_w, (2, 3, 1, 0)).reshape(4 * 128, 768) * s2[None, :]
    b2_t = b2.reshape(1, 768)

    # classifier zero-padded to a lane-dense multiple-of-128 output width
    out_pad = 128 * ((num_classes + 127) // 128)
    w3 = jnp.zeros((768, out_pad), jnp.float32).at[:, :num_classes].set(fc_w.T)
    b3 = jnp.zeros((1, out_pad), jnp.float32).at[0, :num_classes].set(fc_b)

    # weights stored bf16 for MXU; biases stay f32 (added onto f32 accumulators)
    return (w1_bd.astype(jnp.bfloat16), b1_t,
            w2_flat.astype(jnp.bfloat16), b2_t,
            w3.astype(jnp.bfloat16), b3)


def reference_forward(x, params, *, k):
    """Pure-JAX f32 reference mirroring the PyTorch forward (eval-mode BN)."""
    conv1_w, bn1, conv2_w, bn2, fc_w, fc_b = params
    eps = 1e-5
    N, C, H, W = x.shape
    xr = jnp.maximum(x, 0.0)
    xr = xr.reshape(N, C, H // k, k, W // k, k).mean(axis=(3, 5))       # AvgPool -> (N,C,2,2)
    h = jnp.einsum('nchw,dc->ndhw', xr, conv1_w[:, :, 0, 0])            # Conv1x1
    g1, be1, m1, v1 = bn1
    h = (h - m1[None, :, None, None]) / jnp.sqrt(v1[None, :, None, None] + eps) \
        * g1[None, :, None, None] + be1[None, :, None, None]
    h = jnp.maximum(h, 0.0)
    y = jnp.einsum('nihw,oihw->no', h, conv2_w)                         # Conv2x2 -> (N,768)
    g2, be2, m2, v2 = bn2
    y = (y - m2[None, :]) / jnp.sqrt(v2[None, :] + eps) * g2[None, :] + be2[None, :]
    y = jnp.maximum(y, 0.0)
    return y @ fc_w.T + fc_b[None, :]


if __name__ == "__main__":
    key = jax.random.PRNGKey(0)
    kx, kp = jax.random.split(key)

    # large_images=False  =>  k=4, input spatial 8x8
    N, C, k, num_classes = 2, 4, 4, 10
    x = jax.random.normal(kx, (N, C, 2 * k, 2 * k), jnp.float32)
    params = init_params(kp, C, num_classes)
    packed = pack_params(params, k=k)

    out = auxiliary_head_forward(x, packed, k=k, num_classes=num_classes)
    out = jax.block_until_ready(out)

    ref = reference_forward(x, params, k=k)
    assert out.shape == (N, num_classes)
    # bf16 MXU inputs with f32 accumulation -> slightly looser tolerance than pure f32
    assert jnp.allclose(out, ref, atol=1e-2, rtol=1e-2), (out, ref)

    print("KERNEL_OK")
</pallas_src>

<mosaic_0001>
module attributes {stable_mosaic.version = 11 : i64} {
  func.func @_aux_head_kernel(%arg0: i32, %arg1: memref<8x256xf32, #tpu.memory_space<vmem>>, %arg2: memref<256x512xbf16, #tpu.memory_space<vmem>>, %arg3: memref<1x512xf32, #tpu.memory_space<vmem>>, %arg4: memref<512x768xbf16, #tpu.memory_space<vmem>>, %arg5: memref<1x768xf32, #tpu.memory_space<vmem>>, %arg6: memref<768x128xbf16, #tpu.memory_space<vmem>>, %arg7: memref<1x128xf32, #tpu.memory_space<vmem>>, %arg8: memref<8x128xf32, #tpu.memory_space<vmem>>) attributes {dimension_semantics = [#tpu.dimension_semantics<parallel>], iteration_bounds = array<i64: 1>, scalar_prefetch = 0 : i64, scratch_operands = 0 : i64, tpu.core_type = #tpu.core_type<tc>, window_params = [{transform_indices = @transform_0, window_bounds = array<i64: 8, 256>}, {pipeline_mode = #tpu.pipeline_mode<synchronous>, transform_indices = @transform_1, window_bounds = array<i64: 256, 512>}, {pipeline_mode = #tpu.pipeline_mode<synchronous>, transform_indices = @transform_2, window_bounds = array<i64: 1, 512>}, {pipeline_mode = #tpu.pipeline_mode<synchronous>, transform_indices = @transform_3, window_bounds = array<i64: 512, 768>}, {pipeline_mode = #tpu.pipeline_mode<synchronous>, transform_indices = @transform_4, window_bounds = array<i64: 1, 768>}, {pipeline_mode = #tpu.pipeline_mode<synchronous>, transform_indices = @transform_5, window_bounds = array<i64: 768, 128>}, {pipeline_mode = #tpu.pipeline_mode<synchronous>, transform_indices = @transform_6, window_bounds = array<i64: 1, 128>}, {transform_indices = @transform_7, window_bounds = array<i64: 8, 128>}]} {
    %c0 = arith.constant 0 : index
    %c0_0 = arith.constant 0 : index
    %0 = vector.load %arg1[%c0, %c0_0] : memref<8x256xf32, #tpu.memory_space<vmem>>, vector<8x256xf32>
    %cst = arith.constant 0.000000e+00 : f32
    %1 = vector.broadcast %cst : f32 to vector<8x256xf32>
    %2 = arith.maximumf %0, %1 : vector<8x256xf32>
    %3 = arith.truncf %2 : vector<8x256xf32> to vector<8x256xbf16>
    %c0_1 = arith.constant 0 : index
    %c0_2 = arith.constant 0 : index
    %4 = vector.load %arg2[%c0_1, %c0_2] : memref<256x512xbf16, #tpu.memory_space<vmem>>, vector<256x512xbf16>
    %cst_3 = arith.constant dense<0.000000e+00> : vector<8x512xf32>
    %5 = tpu.matmul %3, %4, %cst_3 {dimension_numbers = #tpu.dot_dimension_numbers<[1], [0], [0], [1], [0, 0, 1, 1], [], []>} : vector<8x256xbf16>, vector<256x512xbf16>, vector<8x512xf32> -> vector<8x512xf32>
    %c0_4 = arith.constant 0 : index
    %c0_5 = arith.constant 0 : index
    %6 = vector.load %arg3[%c0_4, %c0_5] : memref<1x512xf32, #tpu.memory_space<vmem>>, vector<1x512xf32>
    %7 = vector.broadcast %6 : vector<1x512xf32> to vector<8x512xf32>
    %8 = arith.addf %5, %7 : vector<8x512xf32>
    %cst_6 = arith.constant 0.000000e+00 : f32
    %9 = vector.broadcast %cst_6 : f32 to vector<8x512xf32>
    %10 = arith.maximumf %8, %9 : vector<8x512xf32>
    %11 = arith.truncf %10 : vector<8x512xf32> to vector<8x512xbf16>
    %c0_7 = arith.constant 0 : index
    %c0_8 = arith.constant 0 : index
    %12 = vector.load %arg4[%c0_7, %c0_8] : memref<512x768xbf16, #tpu.memory_space<vmem>>, vector<512x768xbf16>
    %cst_9 = arith.constant dense<0.000000e+00> : vector<8x768xf32>
    %13 = tpu.matmul %11, %12, %cst_9 {dimension_numbers = #tpu.dot_dimension_numbers<[1], [0], [0], [1], [0, 0, 1, 1], [], []>} : vector<8x512xbf16>, vector<512x768xbf16>, vector<8x768xf32> -> vector<8x768xf32>
    %c0_10 = arith.constant 0 : index
    %c0_11 = arith.constant 0 : index
    %14 = vector.load %arg5[%c0_10, %c0_11] : memref<1x768xf32, #tpu.memory_space<vmem>>, vector<1x768xf32>
    %15 = vector.broadcast %14 : vector<1x768xf32> to vector<8x768xf32>
    %16 = arith.addf %13, %15 : vector<8x768xf32>
    %cst_12 = arith.constant 0.000000e+00 : f32
    %17 = vector.broadcast %cst_12 : f32 to vector<8x768xf32>
    %18 = arith.maximumf %16, %17 : vector<8x768xf32>
    %19 = arith.truncf %18 : vector<8x768xf32> to vector<8x768xbf16>
    %c0_13 = arith.constant 0 : index
    %c0_14 = arith.constant 0 : index
    %20 = vector.load %arg6[%c0_13, %c0_14] : memref<768x128xbf16, #tpu.memory_space<vmem>>, vector<768x128xbf16>
    %cst_15 = arith.constant dense<0.000000e+00> : vector<8x128xf32>
    %21 = tpu.matmul %19, %20, %cst_15 {dimension_numbers = #tpu.dot_dimension_numbers<[1], [0], [0], [1], [0, 0, 1, 1], [], []>} : vector<8x768xbf16>, vector<768x128xbf16>, vector<8x128xf32> -> vector<8x128xf32>
    %c0_16 = arith.constant 0 : index
    %c0_17 = arith.constant 0 : index
    %22 = vector.load %arg7[%c0_16, %c0_17] : memref<1x128xf32, #tpu.memory_space<vmem>>, vector<1x128xf32>
    %23 = vector.broadcast %22 : vector<1x128xf32> to vector<8x128xf32>
    %24 = arith.addf %21, %23 : vector<8x128xf32>
    %c0_18 = arith.constant 0 : index
    %c0_19 = arith.constant 0 : index
    %25 = vector.load %arg8[%c0_18, %c0_19] : memref<8x128xf32, #tpu.memory_space<vmem>>, vector<8x128xf32>
    tpu.vector_store %arg8[%c0_18, %c0_19], %24 {strides = array<i32>} : memref<8x128xf32, #tpu.memory_space<vmem>>, vector<8x128xf32>,
    return
  }
  func.func @transform_0(%arg0: i32) -> (i32, i32) {
    %c0_i32 = arith.constant 0 : i32
    %c0_i32_0 = arith.constant 0 : i32
    return %arg0, %c0_i32 : i32, i32
  }
  func.func @transform_1(%arg0: i32) -> (i32, i32) {
    %c0_i32 = arith.constant 0 : i32
    %c0_i32_0 = arith.constant 0 : i32
    %c0_i32_1 = arith.constant 0 : i32
    return %c0_i32, %c0_i32_0 : i32, i32
  }
  func.func @transform_2(%arg0: i32) -> (i32, i32) {
    %c0_i32 = arith.constant 0 : i32
    %c0_i32_0 = arith.constant 0 : i32
    %c0_i32_1 = arith.constant 0 : i32
    return %c0_i32, %c0_i32_0 : i32, i32
  }
  func.func @transform_3(%arg0: i32) -> (i32, i32) {
    %c0_i32 = arith.constant 0 : i32
    %c0_i32_0 = arith.constant 0 : i32
    %c0_i32_1 = arith.constant 0 : i32
    return %c0_i32, %c0_i32_0 : i32, i32
  }
  func.func @transform_4(%arg0: i32) -> (i32, i32) {
    %c0_i32 = arith.constant 0 : i32
    %c0_i32_0 = arith.constant 0 : i32
    %c0_i32_1 = arith.constant 0 : i32
    return %c0_i32, %c0_i32_0 : i32, i32
  }
  func.func @transform_5(%arg0: i32) -> (i32, i32) {
    %c0_i32 = arith.constant 0 : i32
    %c0_i32_0 = arith.constant 0 : i32
    %c0_i32_1 = arith.constant 0 : i32
    return %c0_i32, %c0_i32_0 : i32, i32
  }
  func.func @transform_6(%arg0: i32) -> (i32, i32) {
    %c0_i32 = arith.constant 0 : i32
    %c0_i32_0 = arith.constant 0 : i32
    %c0_i32_1 = arith.constant 0 : i32
    return %c0_i32, %c0_i32_0 : i32, i32
  }
  func.func @transform_7(%arg0: i32) -> (i32, i32) {
    %c0_i32 = arith.constant 0 : i32
    %c0_i32_0 = arith.constant 0 : i32
    return %arg0, %c0_i32 : i32, i32
  }
}

</mosaic_0001>

<bundles_post_ra>
// kernel: tpu_custom_call.1
= control target key start
LH: loop header
LB: loop body
LE: loop exit
PB: predicated region body
PF: predicated region fallthrough
CT: control target
= control target key end

     0   :  { %12 = vsyncpa [#allocation3], 0  ;;  %s4460_s0 = inlined_call_operand.hbm [shape: f32[8,256], index: 0, kind: input, shape index: {}]   ;;  %s4461_s1 = inlined_call_operand.hbm [shape: bf16[256,512], index: 1, kind: input, shape index: {}]   ;;  %s4462_s2 = inlined_call_operand.hbm [shape: f32[1,512], index: 2, kind: input, shape index: {}]   ;;  %s4463_s3 = inlined_call_operand.hbm [shape: bf16[512,768], index: 3, kind: input, shape index: {}]   ;;  %s4464_s4 = inlined_call_operand.hbm [shape: f32[1,768], index: 4, kind: input, shape index: {}]   ;;  %s4465_s5 = inlined_call_operand.hbm [shape: bf16[768,128], index: 5, kind: input, shape index: {}]   ;;  %s4466_s6 = inlined_call_operand.vmem [shape: f32[1,128], index: 6, kind: input, shape index: {}]   ;;  %s4467_s7 = inlined_call_operand.hbm [shape: f32[8,128], index: 7, kind: output, shape index: {}]  }
   0x1   :  { %13 = vsyncpa [#allocation6], 0 }
   0x2   :  { %14 = vsyncpa [#allocation9], 0 }
   0x3   :  { %15 = vsyncpa [#allocation12], 0  ;;  %s32_s26 = sshll.u32 %s4461_s1, 4  ;;  %s33_s26 = int_to_ptr.hbm [resolvable:$true] %s32_s26 }
   0x4   :  { %16 = vsyncpa [#allocation4], 0  ;;  %s4316_s27 = smov [#allocation5]   ;;  %s56_s8 = sshll.u32 %s4463_s3, 4  ;;  %s57_s8 = int_to_ptr.hbm [resolvable:$true] %s56_s8 }
   0x5   :  { %s34_s28 = sshll.u32 %s4316_s27, 4  ;;  %s4317_s9 = smov 256   ;;  %s35_s28 = int_to_ptr.vmem [resolvable:$true] %s34_s28 }
   0x6   :  { %s4318_s10 = smov 16   ;;  %s4319_s11 = smov [#allocation8]  }
   0x7   :  { %40 = dma.hbm_to_vmem [thread:$0]  %s33_s26, 8192, %s35_s28, [#allocation6], %s4317_s9, %s4317_s9, %s4318_s10  }
   0x8   :  { %s58_s12 = sshll.u32 %s4319_s11, 4  ;;  %s4320_s13 = smov 384   ;;  %s59_s12 = int_to_ptr.vmem [resolvable:$true] %s58_s12 }
   0x9   :  { %s4321_s14 = smov 24   ;;  %s22_s16 = sshll.u32 %s4460_s0, 4  ;;  %s23_s16 = int_to_ptr.hbm [resolvable:$true] %s22_s16 }
   0xa   :  { %64 = dma.hbm_to_vmem [thread:$0]  %s57_s8, 24576, %s59_s12, [#allocation9], %s4320_s13, %s4320_s13, %s4321_s14  }
   0xb   :  { %s4322_s17 = smov [#allocation2]   ;;  %s46_s20 = sshll.u32 %s4462_s2, 4  ;;  %s47_s20 = int_to_ptr.hbm [resolvable:$true] %s46_s20 }
   0xc   :  { %s24_s18 = sshll.u32 %s4322_s17, 4  ;;  %s4323_s21 = smov [#allocation7]   ;;  %s25_s18 = int_to_ptr.vmem [resolvable:$true] %s24_s18 }
   0xd   :  { %27 = dma.hbm_to_vmem [thread:$0]  %s23_s16, 256, %s25_s18, [#allocation3]  }
   0xe   :  { %s48_s22 = sshll.u32 %s4323_s21, 4  ;;  %s70_s25 = sshll.u32 %s4464_s4, 4  ;;  %s49_s22 = int_to_ptr.vmem [resolvable:$true] %s48_s22  ;;  %s71_s25 = int_to_ptr.hbm [resolvable:$true] %s70_s25 }
   0xf   :  { %51 = dma.hbm_to_vmem [thread:$0]  %s47_s20, 64, %s49_s22, [#allocation6]  }
  0x10   :  { %s80_s27 = sshll.u32 %s4465_s5, 4  ;;  %s4324_s28 = smov [#allocation10]   ;;  %s81_s27 = int_to_ptr.hbm [resolvable:$true] %s80_s27 }
  0x11   :  { %s72_s29 = sshll.u32 %s4324_s28, 4  ;;  %s4325_s2 = smov [#allocation11]   ;;  %s73_s29 = int_to_ptr.vmem [resolvable:$true] %s72_s29 }
  0x12   :  { %75 = dma.hbm_to_vmem [thread:$0]  %s71_s25, 96, %s73_s29, [#allocation9]  }
  0x13   :  { %s82_s30 = sshll.u32 %s4325_s2, 4  ;;  %s4326_s8 = smov 64   ;;  %s83_s30 = int_to_ptr.vmem [resolvable:$true] %s82_s30 }
  0x14   :  { %s4327_s9 = smov 4  }
  0x15   :  { %88 = dma.hbm_to_vmem [thread:$0]  %s81_s27, 6144, %s83_s30, [#allocation12], %s4326_s8, %s4326_s8, %s4327_s9  }
  0x16   :  { %4306 = dma.done.wait [#allocation3], 256  }
  0x17   :  { %4307 = vsyncadd [#allocation3], 4294967040 }
  0x18   :  { %4308 = dma.done.wait [#allocation6], 8256  }
  0x19   :  { %4309 = vsyncadd [#allocation6], 4294959040 }
  0x1a   :  { %4310 = dma.done.wait [#allocation9], 24672  }
  0x1b   :  { %4311 = vsyncadd [#allocation9], 4294942624 }
  0x1c   :  { %4312 = dma.done.wait [#allocation12], 6144  }
  0x1d   :  { %4313 = vsyncadd [#allocation12], 4294961152  ;;  %v2718_v0 = vld [vmem:[#allocation5 + $0xe0] sm:$0xf]  ;;  %v3850_v1 = vld [vmem:[#allocation5 + $0xec] sm:$0xf0] }
  0x1e   :  { %v2846_v2 = vld [vmem:[#allocation5 + $0x1e0] sm:$0xf]  ;;  %v2719_v3 = vor.u32 %v3850_v1, %v2718_v0  ;;  %v3882_v4 = vld [vmem:[#allocation5 + $0x1ec] sm:$0xf0]  ;;  %v3848_v5 = vld [vmem:[#allocation5 + $0xe4] sm:$0xf] }
  0x1f   :  { %v2720_v6 = vld [vmem:[#allocation5 + $0xf0] sm:$0xf0]  ;;  %v2847_v7 = vor.u32 %v3882_v4, %v2846_v2  ;;  %v3880_v9 = vld [vmem:[#allocation5 + $0x1e4] sm:$0xf]  ;;  %v2702_v11 = vld [vmem:[#allocation5 + $0xc0] sm:$0xf] }
  0x20   :  { %v2723_v8 = vor.u32 %v3848_v5, %v2720_v6  ;;  %v2848_v10 = vld [vmem:[#allocation5 + $0x1f0] sm:$0xf0]  ;;  %515 = vmatpush.bf16.msra.mxu0 %v2719_v3  ;;  %v3846_v13 = vld [vmem:[#allocation5 + $0xcc] sm:$0xf0]  ;;  %v2830_v14 = vld [vmem:[#allocation5 + $0x1c0] sm:$0xf] }
  0x21   :  { %v2851_v12 = vor.u32 %v3880_v9, %v2848_v10  ;;  %v3878_v15 = vld [vmem:[#allocation5 + $0x1cc] sm:$0xf0]  ;;  %528 = vmatpush.bf16.msra.mxu1 %v2847_v7  ;;  %v2703_v16 = vor.u32 %v3846_v13, %v2702_v11  ;;  %v3844_v18 = vld [vmem:[#allocation5 + $0xc4] sm:$0xf]  ;;  %v2704_v19 = vld [vmem:[#allocation5 + $0xd0] sm:$0xf0] }
  0x22   :  { %541 = vmatpush.bf16.msra.mxu2 %v2723_v8  ;;  %v2831_v17 = vor.u32 %v3878_v15, %v2830_v14  ;;  %v3876_v20 = vld [vmem:[#allocation5 + $0x1c4] sm:$0xf]  ;;  %v2707_v21 = vor.u32 %v3844_v18, %v2704_v19  ;;  %v2832_v22 = vld [vmem:[#allocation5 + $0x1d0] sm:$0xf0]  ;;  %v2686_v23 = vld [vmem:[#allocation5 + $0xa0] sm:$0xf] }
  0x23   :  { %554 = vmatpush.bf16.msra.mxu3 %v2851_v12  ;;  %v3842_v24 = vld [vmem:[#allocation5 + $0xac] sm:$0xf0]  ;;  %v2835_v25 = vor.u32 %v3876_v20, %v2832_v22  ;;  %v2814_v26 = vld [vmem:[#allocation5 + $0x1a0] sm:$0xf]  ;;  %v3840_v28 = vld [vmem:[#allocation5 + $0xa4] sm:$0xf] }
  0x24   :  { %v3874_v27 = vld [vmem:[#allocation5 + $0x1ac] sm:$0xf0]  ;;  %516 = vmatpush.bf16.msra.mxu0 %v2703_v16  ;;  %v2687_v29 = vor.u32 %v3842_v24, %v2686_v23  ;;  %v2688_v30 = vld [vmem:[#allocation5 + $0xb0] sm:$0xf0]  ;;  %v3872_v31 = vld [vmem:[#allocation5 + $0x1a4] sm:$0xf] }
  0x25   :  { %v2816_v32 = vld [vmem:[#allocation5 + $0x1b0] sm:$0xf0]  ;;  %529 = vmatpush.bf16.msra.mxu1 %v2831_v17  ;;  %v2815_v33 = vor.u32 %v3874_v27, %v2814_v26  ;;  %v2691_v34 = vor.u32 %v3840_v28, %v2688_v30  ;;  %v2670_v35 = vld [vmem:[#allocation5 + $0x80] sm:$0xf]  ;;  %v3838_v36 = vld [vmem:[#allocation5 + $0x8c] sm:$0xf0] }
  0x26   :  { %542 = vmatpush.bf16.msra.mxu2 %v2707_v21  ;;  %v2798_v37 = vld [vmem:[#allocation5 + $0x180] sm:$0xf]  ;;  %v2819_v38 = vor.u32 %v3872_v31, %v2816_v32  ;;  %v3870_v39 = vld [vmem:[#allocation5 + $0x18c] sm:$0xf0]  ;;  %v3836_v40 = vld [vmem:[#allocation5 + $0x84] sm:$0xf]  ;;  %v2671_v44 = vor.u32 %v3838_v36, %v2670_v35 }
  0x27   :  { %555 = vmatpush.bf16.msra.mxu3 %v2835_v25  ;;  %v2672_v41 = vld [vmem:[#allocation5 + $0x90] sm:$0xf0]  ;;  %v3868_v42 = vld [vmem:[#allocation5 + $0x184] sm:$0xf]  ;;  %v2799_v45 = vor.u32 %v3870_v39, %v2798_v37  ;;  %v2654_v47 = vld [vmem:[#allocation5 + $0x60] sm:$0xf] }
  0x28   :  { %v2800_v43 = vld [vmem:[#allocation5 + $0x190] sm:$0xf0]  ;;  %517 = vmatpush.bf16.msra.mxu0 %v2687_v29  ;;  %v2675_v46 = vor.u32 %v3836_v40, %v2672_v41  ;;  %v3834_v48 = vld [vmem:[#allocation5 + $0x6c] sm:$0xf0]  ;;  %v2782_v49 = vld [vmem:[#allocation5 + $0x160] sm:$0xf] }
  0x29   :  { %530 = vmatpush.bf16.msra.mxu1 %v2815_v33  ;;  %v2803_v50 = vor.u32 %v3868_v42, %v2800_v43  ;;  %v3866_v51 = vld [vmem:[#allocation5 + $0x16c] sm:$0xf0]  ;;  %v3832_v52 = vld [vmem:[#allocation5 + $0x64] sm:$0xf]  ;;  %v2656_v53 = vld [vmem:[#allocation5 + $0x70] sm:$0xf0]  ;;  %v2655_v56 = vor.u32 %v3834_v48, %v2654_v47 }
  0x2a   :  { %543 = vmatpush.bf16.msra.mxu2 %v2691_v34  ;;  %v3864_v54 = vld [vmem:[#allocation5 + $0x164] sm:$0xf]  ;;  %v2784_v55 = vld [vmem:[#allocation5 + $0x170] sm:$0xf0]  ;;  %v2783_v57 = vor.u32 %v3866_v51, %v2782_v49  ;;  %v2659_v58 = vor.u32 %v3832_v52, %v2656_v53  ;;  %v2638_v59 = vld [vmem:[#allocation5 + $0x40] sm:$0xf] }
  0x2b   :  { %556 = vmatpush.bf16.msra.mxu3 %v2819_v38  ;;  %v3830_v60 = vld [vmem:[#allocation5 + $0x4c] sm:$0xf0]  ;;  %v2766_v61 = vld [vmem:[#allocation5 + $0x140] sm:$0xf]  ;;  %v2787_v62 = vor.u32 %v3864_v54, %v2784_v55  ;;  %v3828_v0 = vld [vmem:[#allocation5 + $0x44] sm:$0xf] }
  0x2c   :  { %518 = vmatpush.bf16.msra.mxu0 %v2671_v44  ;;  %v3862_v63 = vld [vmem:[#allocation5 + $0x14c] sm:$0xf0]  ;;  %v2640_v1 = vld [vmem:[#allocation5 + $0x50] sm:$0xf0]  ;;  %v3860_v2 = vld [vmem:[#allocation5 + $0x144] sm:$0xf]  ;;  %v2639_v4 = vor.u32 %v3830_v60, %v2638_v59 }
  0x2d   :  { %531 = vmatpush.bf16.msra.mxu1 %v2799_v45  ;;  %v2768_v3 = vld [vmem:[#allocation5 + $0x150] sm:$0xf0]  ;;  %v2622_v5 = vld [vmem:[#allocation5 + $0x20] sm:$0xf]  ;;  %v2767_v6 = vor.u32 %v3862_v63, %v2766_v61  ;;  %v2643_v7 = vor.u32 %v3828_v0, %v2640_v1  ;;  %v3826_v8 = vld [vmem:[#allocation5 + $0x2c] sm:$0xf0] }
  0x2e   :  { %544 = vmatpush.bf16.msra.mxu2 %v2675_v46  ;;  %v2750_v9 = vld [vmem:[#allocation5 + $0x120] sm:$0xf]  ;;  %v3858_v10 = vld [vmem:[#allocation5 + $0x12c] sm:$0xf0]  ;;  %v2771_v11 = vor.u32 %v3860_v2, %v2768_v3  ;;  %v3824_v12 = vld [vmem:[#allocation5 + $0x24] sm:$0xf]  ;;  %v2623_v18 = vor.u32 %v3826_v8, %v2622_v5 }
  0x2f   :  { %557 = vmatpush.bf16.msra.mxu3 %v2803_v50  ;;  %v2624_v13 = vld [vmem:[#allocation5 + $0x30] sm:$0xf0]  ;;  %v3856_v14 = vld [vmem:[#allocation5 + $0x124] sm:$0xf]  ;;  %v2606_v16 = vld [vmem:[#allocation5] sm:$0xf]  ;;  %v2751_v22 = vor.u32 %v3858_v10, %v2750_v9 }
  0x30   :  { %519 = vmatpush.bf16.msra.mxu0 %v2655_v56  ;;  %v2752_v15 = vld [vmem:[#allocation5 + $0x130] sm:$0xf0]  ;;  %v3822_v17 = vld [vmem:[#allocation5 + $0xc] sm:$0xf0]  ;;  %v2734_v19 = vld [vmem:[#allocation5 + $0x100] sm:$0xf]  ;;  %v2627_v23 = vor.u32 %v3824_v12, %v2624_v13 }
  0x31   :  { %532 = vmatpush.bf16.msra.mxu1 %v2783_v57  ;;  %v3854_v20 = vld [vmem:[#allocation5 + $0x10c] sm:$0xf0]  ;;  %v3820_v21 = vld [vmem:[#allocation5 + $0x4] sm:$0xf]  ;;  %v2608_v24 = vld [vmem:[#allocation5 + $0x10] sm:$0xf0]  ;;  %v2755_v27 = vor.u32 %v3856_v14, %v2752_v15  ;;  %v2607_v34 = vor.u32 %v3822_v17, %v2606_v16 }
  0x32   :  { %545 = vmatpush.bf16.msra.mxu2 %v2659_v58  ;;  %v3852_v25 = vld [vmem:[#allocation5 + $0x104] sm:$0xf]  ;;  %v115_v26 = vld [vmem:[#allocation2] sm:$0xff]  ;;  %v2726_v29 = vld [vmem:[#allocation5 + $0xe8] sm:$0xf]  ;;  %v2735_v38 = vor.u32 %v3854_v20, %v2734_v19  ;;  %v2611_v39 = vor.u32 %v3820_v21, %v2608_v24  ;;  %s4328_s10 = smov [#allocation13]  }
  0x33   :  { %558 = vmatpush.bf16.msra.mxu3 %v2787_v62  ;;  %v2736_v28 = vld [vmem:[#allocation5 + $0x110] sm:$0xf0]  ;;  %v116_v30 = vld [vmem:[#allocation2 + $0x8] sm:$0xff]  ;;  %v2854_v32 = vld [vmem:[#allocation5 + $0x1e8] sm:$0xf]  ;;  %v117_v37 = vmax.f32 %v115_v26, 0.0 }
  0x34   :  { %520 = vmatpush.bf16.msra.mxu0 %v2639_v4  ;;  %v3851_v31 = vld [vmem:[#allocation5 + $0xf4] sm:$0xf0]  ;;  %v3849_v35 = vld [vmem:[#allocation5 + $0xec] sm:$0xf]  ;;  %v2728_v36 = vld [vmem:[#allocation5 + $0xf8] sm:$0xf0]  ;;  %v2739_v43 = vor.u32 %v3852_v25, %v2736_v28 }
  0x35   :  { %533 = vmatpush.bf16.msra.mxu1 %v2767_v6  ;;  %v3883_v33 = vld [vmem:[#allocation5 + $0x1f4] sm:$0xf0]  ;;  %v3881_v40 = vld [vmem:[#allocation5 + $0x1ec] sm:$0xf]  ;;  %v2856_v41 = vld [vmem:[#allocation5 + $0x1f8] sm:$0xf0]  ;;  %v2727_v44 = vor.u32 %v3851_v31, %v2726_v29  ;;  %v2731_v46 = vor.u32 %v3849_v35, %v2728_v36  ;;  %v4387_v51 = vpack.c.bf16 %v117_v37, %v117_v37 }
  0x36   :  { %546 = vmatpush.bf16.msra.mxu2 %v2643_v7  ;;  %v118_v42 = vmax.f32 %v116_v30, 0.0  ;;  %v2855_v45 = vor.u32 %v3883_v33, %v2854_v32  ;;  %v2710_v47 = vld [vmem:[#allocation5 + $0xc8] sm:$0xf]  ;;  %v3847_v48 = vld [vmem:[#allocation5 + $0xd4] sm:$0xf0]  ;;  %v2859_v50 = vor.u32 %v3881_v40, %v2856_v41  ;;  %s2589_s11 = sshll.u32 %s4328_s10, 4  ;;  %s2590_s11 = int_to_ptr.vmem [resolvable:$true] %s2589_s11 }
  0x37   :  { %559 = vmatpush.bf16.msra.mxu3 %v2771_v11  ;;  %v2838_v49 = vld [vmem:[#allocation5 + $0x1c8] sm:$0xf]  ;;  %v3879_v52 = vld [vmem:[#allocation5 + $0x1d4] sm:$0xf0]  ;;  %v3845_v53 = vld [vmem:[#allocation5 + $0xcc] sm:$0xf]  ;;  %v2711_v58 = vor.u32 %v3847_v48, %v2710_v47 }
  0x38   :  { %521 = vmatpush.bf16.msra.mxu0 %v2623_v18  ;;  %v2712_v54 = vld [vmem:[#allocation5 + $0xd8] sm:$0xf0]  ;;  %v4389_v55 = vpack.c.bf16 %v118_v42, %v118_v42  ;;  %v3877_v56 = vld [vmem:[#allocation5 + $0x1cc] sm:$0xf]  ;;  %v2839_v59 = vor.u32 %v3879_v52, %v2838_v49  ;;  %v2694_v61 = vld [vmem:[#allocation5 + $0xa8] sm:$0xf] }
  0x39   :  { %534 = vmatpush.bf16.msra.mxu1 %v2751_v22  ;;  %v2840_v57 = vld [vmem:[#allocation5 + $0x1d8] sm:$0xf0]  ;;  %v2715_v60 = vor.u32 %v3845_v53, %v2712_v54  ;;  %v3843_v62 = vld [vmem:[#allocation5 + $0xb4] sm:$0xf0]  ;;  %v2822_v63 = vld [vmem:[#allocation5 + $0x1a8] sm:$0xf] }
  0x3a   :  { %547 = vmatpush.bf16.msra.mxu2 %v2627_v23  ;;  %v2843_v0 = vor.u32 %v3877_v56, %v2840_v57  ;;  %v3875_v1 = vld [vmem:[#allocation5 + $0x1b4] sm:$0xf0]  ;;  %v3841_v2 = vld [vmem:[#allocation5 + $0xac] sm:$0xf]  ;;  %v2696_v3 = vld [vmem:[#allocation5 + $0xb8] sm:$0xf0]  ;;  %v2695_v6 = vor.u32 %v3843_v62, %v2694_v61 }
  0x3b   :  { %560 = vmatpush.bf16.msra.mxu3 %v2755_v27  ;;  %v3873_v4 = vld [vmem:[#allocation5 + $0x1ac] sm:$0xf]  ;;  %v2824_v5 = vld [vmem:[#allocation5 + $0x1b8] sm:$0xf0]  ;;  %v2823_v7 = vor.u32 %v3875_v1, %v2822_v63  ;;  %v2699_v8 = vor.u32 %v3841_v2, %v2696_v3  ;;  %v2678_v9 = vld [vmem:[#allocation5 + $0x88] sm:$0xf] }
  0x3c   :  { %522 = vmatpush.bf16.msra.mxu0 %v2607_v34  ;;  %v3839_v10 = vld [vmem:[#allocation5 + $0x94] sm:$0xf0]  ;;  %v2806_v11 = vld [vmem:[#allocation5 + $0x188] sm:$0xf]  ;;  %v2827_v12 = vor.u32 %v3873_v4, %v2824_v5  ;;  %v3837_v14 = vld [vmem:[#allocation5 + $0x8c] sm:$0xf] }
  0x3d   :  { %535 = vmatpush.bf16.msra.mxu1 %v2735_v38  ;;  %v3871_v13 = vld [vmem:[#allocation5 + $0x194] sm:$0xf0]  ;;  %v2680_v15 = vld [vmem:[#allocation5 + $0x98] sm:$0xf0]  ;;  %v3869_v16 = vld [vmem:[#allocation5 + $0x18c] sm:$0xf]  ;;  %v2679_v18 = vor.u32 %v3839_v10, %v2678_v9 }
  0x3e   :  { %548 = vmatpush.bf16.msra.mxu2 %v2611_v39  ;;  %v2808_v17 = vld [vmem:[#allocation5 + $0x198] sm:$0xf0]  ;;  %v2807_v19 = vor.u32 %v3871_v13, %v2806_v11  ;;  %v2683_v20 = vor.u32 %v3837_v14, %v2680_v15  ;;  %v2662_v21 = vld [vmem:[#allocation5 + $0x68] sm:$0xf]  ;;  %v3835_v22 = vld [vmem:[#allocation5 + $0x74] sm:$0xf0] }
  0x3f   :  { %561 = vmatpush.bf16.msra.mxu3 %v2739_v43  ;;  %523 = vmatmul.bf16.vlgmr.msra.gmra.mxu0 %v4387_v51  ;;  %v2790_v23 = vld [vmem:[#allocation5 + $0x168] sm:$0xf]  ;;  %v2811_v24 = vor.u32 %v3869_v16, %v2808_v17  ;;  %v3867_v25 = vld [vmem:[#allocation5 + $0x174] sm:$0xf0]  ;;  %v3833_v26 = vld [vmem:[#allocation5 + $0x6c] sm:$0xf]  ;;  %v2663_v30 = vor.u32 %v3835_v22, %v2662_v21 }
  0x40   :  { %567 = vmatpush.bf16.msrb.mxu0 %v2727_v44  ;;  %536 = vmatmul.bf16.vlgmr.msra.gmra.mxu1 %v4389_v55  ;;  %v2664_v27 = vld [vmem:[#allocation5 + $0x78] sm:$0xf0]  ;;  %v3865_v28 = vld [vmem:[#allocation5 + $0x16c] sm:$0xf]  ;;  %v2791_v31 = vor.u32 %v3867_v25, %v2790_v23  ;;  %v2646_v33 = vld [vmem:[#allocation5 + $0x48] sm:$0xf] }
  0x41   :  { %580 = vmatpush.bf16.msrb.mxu1 %v2855_v45  ;;  %549 = vmatmul.bf16.vlgmr.msra.gmra.mxu2 %v4387_v51  ;;  %v2792_v29 = vld [vmem:[#allocation5 + $0x178] sm:$0xf0]  ;;  %v2667_v32 = vor.u32 %v3833_v26, %v2664_v27  ;;  %v3831_v34 = vld [vmem:[#allocation5 + $0x54] sm:$0xf0]  ;;  %v2774_v35 = vld [vmem:[#allocation5 + $0x148] sm:$0xf] }
  0x42   :  { %593 = vmatpush.bf16.msrb.mxu2 %v2731_v46  ;;  %562 = vmatmul.bf16.vlgmr.msra.gmra.mxu3 %v4389_v55  ;;  %v2795_v36 = vor.u32 %v3865_v28, %v2792_v29  ;;  %v3863_v37 = vld [vmem:[#allocation5 + $0x154] sm:$0xf0]  ;;  %v3829_v38 = vld [vmem:[#allocation5 + $0x4c] sm:$0xf]  ;;  %v2648_v39 = vld [vmem:[#allocation5 + $0x58] sm:$0xf0]  ;;  %v2647_v42 = vor.u32 %v3831_v34, %v2646_v33 }
  0x43   :  { %606 = vmatpush.bf16.msrb.mxu3 %v2859_v50  ;;  %v3861_v40 = vld [vmem:[#allocation5 + $0x14c] sm:$0xf]  ;;  %v2776_v41 = vld [vmem:[#allocation5 + $0x158] sm:$0xf0]  ;;  %v2630_v43 = vld [vmem:[#allocation5 + $0x28] sm:$0xf]  ;;  %v2775_v44 = vor.u32 %v3863_v37, %v2774_v35  ;;  %v2651_v45 = vor.u32 %v3829_v38, %v2648_v39 }
  0x44   :  { %568 = vmatpush.bf16.msrb.mxu0 %v2711_v58  ;;  %v3827_v46 = vld [vmem:[#allocation5 + $0x34] sm:$0xf0]  ;;  %v2758_v47 = vld [vmem:[#allocation5 + $0x128] sm:$0xf]  ;;  %v2779_v48 = vor.u32 %v3861_v40, %v2776_v41  ;;  %v3825_v50 = vld [vmem:[#allocation5 + $0x2c] sm:$0xf] }
  0x45   :  { %581 = vmatpush.bf16.msrb.mxu1 %v2839_v59  ;;  %v3859_v49 = vld [vmem:[#allocation5 + $0x134] sm:$0xf0]  ;;  %v2632_v52 = vld [vmem:[#allocation5 + $0x38] sm:$0xf0]  ;;  %v3857_v53 = vld [vmem:[#allocation5 + $0x12c] sm:$0xf]  ;;  %v2631_v56 = vor.u32 %v3827_v46, %v2630_v43 }
  0x46   :  { %594 = vmatpush.bf16.msrb.mxu2 %v2715_v60  ;;  %v2760_v54 = vld [vmem:[#allocation5 + $0x138] sm:$0xf0]  ;;  %v2614_v57 = vld [vmem:[#allocation5 + $0x8] sm:$0xf]  ;;  %v2759_v58 = vor.u32 %v3859_v49, %v2758_v47  ;;  %v2635_v59 = vor.u32 %v3825_v50, %v2632_v52  ;;  %v3823_v60 = vld [vmem:[#allocation5 + $0x14] sm:$0xf0] }
  0x47   :  { %607 = vmatpush.bf16.msrb.mxu3 %v2843_v0  ;;  %v2742_v61 = vld [vmem:[#allocation5 + $0x108] sm:$0xf]  ;;  %v3855_v62 = vld [vmem:[#allocation5 + $0x114] sm:$0xf0]  ;;  %v2763_v63 = vor.u32 %v3857_v53, %v2760_v54  ;;  %v3821_v0 = vld [vmem:[#allocation5 + $0xc] sm:$0xf] }
  0x48   :  { %569 = vmatpush.bf16.msrb.mxu0 %v2695_v6  ;;  %v2616_v1 = vld [vmem:[#allocation5 + $0x18] sm:$0xf0]  ;;  %v3853_v2 = vld [vmem:[#allocation5 + $0x10c] sm:$0xf]  ;;  %v3030_v4 = vld [vmem:[#allocation8 + $0x150] sm:$0xf]  ;;  %v2615_v6 = vor.u32 %v3823_v60, %v2614_v57  ;;  %v2743_v9 = vor.u32 %v3855_v62, %v2742_v61 }
  0x49   :  { %582 = vmatpush.bf16.msrb.mxu1 %v2823_v7  ;;  %v2744_v3 = vld [vmem:[#allocation5 + $0x118] sm:$0xf0]  ;;  %v3929_v5 = vld [vmem:[#allocation8 + $0x164] sm:$0xf0]  ;;  %v3222_v7 = vld [vmem:[#allocation8 + $0x2d0] sm:$0xf]  ;;  %v2619_v10 = vor.u32 %v3821_v0, %v2616_v1 }
  0x4a   :  { %595 = vmatpush.bf16.msrb.mxu2 %v2699_v8  ;;  %v3977_v8 = vld [vmem:[#allocation8 + $0x2e4] sm:$0xf0]  ;;  %v2747_v11 = vor.u32 %v3853_v2, %v2744_v3  ;;  %v3414_v13 = vld [vmem:[#allocation8 + $0x450] sm:$0xf]  ;;  %v3006_v15 = vld [vmem:[#allocation8 + $0x120] sm:$0xf] }
  0x4b   :  { %608 = vmatpush.bf16.msrb.mxu3 %v2827_v12  ;;  %v3031_v12 = vor.u32 %v3929_v5, %v3030_v4  ;;  %v4025_v14 = vld [vmem:[#allocation8 + $0x464] sm:$0xf0]  ;;  %v3923_v16 = vld [vmem:[#allocation8 + $0x134] sm:$0xf0]  ;;  %v3223_v17 = vor.u32 %v3977_v8, %v3222_v7  ;;  %v3390_v22 = vld [vmem:[#allocation8 + $0x420] sm:$0xf] }
  0x4c   :  { %570 = vmatpush.bf16.msrb.mxu0 %v2679_v18  ;;  %v3198_v18 = vld [vmem:[#allocation8 + $0x2a0] sm:$0xf]  ;;  %v3007_v21 = vor.u32 %v3923_v16, %v3006_v15  ;;  %v4019_v23 = vld [vmem:[#allocation8 + $0x434] sm:$0xf0]  ;;  %v3917_v25 = vld [vmem:[#allocation8 + $0x104] sm:$0xf0] }
  0x4d   :  { %583 = vmatpush.bf16.msrb.mxu1 %v2807_v19  ;;  %v3971_v19 = vld [vmem:[#allocation8 + $0x2b4] sm:$0xf0]  ;;  %v3606_v27 = vld [vmem:[#allocation8 + $0x5d0] sm:$0xf]  ;;  %v3965_v29 = vld [vmem:[#allocation8 + $0x284] sm:$0xf0] }
  0x4e   :  { %596 = vmatpush.bf16.msrb.mxu2 %v2683_v20  ;;  %v3415_v20 = vor.u32 %v4025_v14, %v3414_v13  ;;  %v3199_v26 = vor.u32 %v3971_v19, %v3198_v18  ;;  %v3174_v28 = vld [vmem:[#allocation8 + $0x270] sm:$0xf]  ;;  %v2958_v34 = vld [vmem:[#allocation8 + $0xc0] sm:$0xf]  ;;  %v3911_v37 = vld [vmem:[#allocation8 + $0xd4] sm:$0xf0] }
  0x4f   :  { %609 = vmatpush.bf16.msrb.mxu3 %v2811_v24  ;;  %v2982_v24 = vld [vmem:[#allocation8 + $0xf0] sm:$0xf]  ;;  %v3175_v38 = vor.u32 %v3965_v29, %v3174_v28  ;;  %v3582_v39 = vld [vmem:[#allocation8 + $0x5a0] sm:$0xf]  ;;  %v4067_v40 = vld [vmem:[#allocation8 + $0x5b4] sm:$0xf0] }
  0x50   :  { %571 = vmatpush.bf16.msrb.mxu0 %v2663_v30  ;;  %v4073_v30 = vld [vmem:[#allocation8 + $0x5e4] sm:$0xf0]  ;;  %v2983_v33 = vor.u32 %v3917_v25, %v2982_v24  ;;  %v3366_v35 = vld [vmem:[#allocation8 + $0x3f0] sm:$0xf]  ;;  %v3959_v41 = vld [vmem:[#allocation8 + $0x254] sm:$0xf0] }
  0x51   :  { %584 = vmatpush.bf16.msrb.mxu1 %v2791_v31  ;;  %v3391_v31 = vor.u32 %v4019_v23, %v3390_v22  ;;  %v4007_v46 = vld [vmem:[#allocation8 + $0x3d4] sm:$0xf0]  ;;  %v3905_v47 = vld [vmem:[#allocation8 + $0xa4] sm:$0xf0]  ;;  %v3558_v49 = vld [vmem:[#allocation8 + $0x570] sm:$0xf] }
  0x52   :  { %597 = vmatpush.bf16.msrb.mxu2 %v2667_v32  ;;  %v3607_v32 = vor.u32 %v4073_v30, %v3606_v27  ;;  %v4061_v50 = vld [vmem:[#allocation8 + $0x584] sm:$0xf0]  ;;  %v3126_v52 = vld [vmem:[#allocation8 + $0x210] sm:$0xf]  ;;  %v3899_v61 = vld [vmem:[#allocation8 + $0x74] sm:$0xf0] }
  0x53   :  { %610 = vmatpush.bf16.msrb.mxu3 %v2795_v36  ;;  %v4013_v36 = vld [vmem:[#allocation8 + $0x404] sm:$0xf0]  ;;  %v3559_v54 = vor.u32 %v4061_v50, %v3558_v49  ;;  %v4055_v0 = vld [vmem:[#allocation8 + $0x554] sm:$0xf0]  ;;  %v3102_v1 = vld [vmem:[#allocation8 + $0x1e0] sm:$0xf] }
  0x54   :  { %572 = vmatpush.bf16.msrb.mxu0 %v2647_v42  ;;  %v3583_v42 = vor.u32 %v4067_v40, %v3582_v39  ;;  %v3367_v43 = vor.u32 %v4013_v36, %v3366_v35  ;;  %v3953_v53 = vld [vmem:[#allocation8 + $0x224] sm:$0xf0]  ;;  %v3947_v2 = vld [vmem:[#allocation8 + $0x1f4] sm:$0xf0]  ;;  %v3926_v14 = vld [vmem:[#allocation8 + $0x154] sm:$0xf] }
  0x55   :  { %585 = vmatpush.bf16.msrb.mxu1 %v2775_v44  ;;  %v2934_v44 = vld [vmem:[#allocation8 + $0x90] sm:$0xf]  ;;  %v4001_v60 = vld [vmem:[#allocation8 + $0x3a4] sm:$0xf0]  ;;  %v3127_v62 = vor.u32 %v3953_v53, %v3126_v52  ;;  %v3103_v8 = vor.u32 %v3947_v2, %v3102_v1  ;;  %v3887_v13 = vld [vmem:[#allocation8 + $0x14] sm:$0xf0] }
  0x56   :  { %598 = vmatpush.bf16.msrb.mxu2 %v2651_v45  ;;  %v3342_v45 = vld [vmem:[#allocation8 + $0x3c0] sm:$0xf]  ;;  %v2935_v57 = vor.u32 %v3905_v47, %v2934_v44  ;;  %v3893_v7 = vld [vmem:[#allocation8 + $0x44] sm:$0xf0]  ;;  %v3032_v16 = vld [vmem:[#allocation8 + $0x168] sm:$0xf0] }
  0x57   :  { %611 = vmatpush.bf16.msrb.mxu3 %v2779_v48  ;;  %v3935_v18 = vld [vmem:[#allocation8 + $0x194] sm:$0xf0]  ;;  %v3974_v19 = vld [vmem:[#allocation8 + $0x2d4] sm:$0xf]  ;;  %v3035_v22 = vor.u32 %v3926_v14, %v3032_v16  ;;  %v3920_v24 = vld [vmem:[#allocation8 + $0x124] sm:$0xf] }
  0x58   :  { %573 = vmatpush.bf16.msrb.mxu0 %v2631_v56  ;;  %v3343_v56 = vor.u32 %v4007_v46, %v3342_v45  ;;  %v3008_v25 = vld [vmem:[#allocation8 + $0x138] sm:$0xf0]  ;;  %v3968_v27 = vld [vmem:[#allocation8 + $0x2a4] sm:$0xf]  ;;  %v3914_v30 = vld [vmem:[#allocation8 + $0xf4] sm:$0xf] }
  0x59   :  { %586 = vmatpush.bf16.msrb.mxu1 %v2759_v58  ;;  %v2910_v58 = vld [vmem:[#allocation8 + $0x60] sm:$0xf]  ;;  %v3200_v28 = vld [vmem:[#allocation8 + $0x2b8] sm:$0xf0]  ;;  %v3011_v29 = vor.u32 %v3920_v24, %v3008_v25  ;;  %v3908_v36 = vld [vmem:[#allocation8 + $0xc4] sm:$0xf] }
  0x5a   :  { %599 = vmatpush.bf16.msrb.mxu2 %v2635_v59  ;;  %v3318_v59 = vld [vmem:[#allocation8 + $0x390] sm:$0xf]  ;;  %v2911_v5 = vor.u32 %v3899_v61, %v2910_v58  ;;  %v3956_v39 = vld [vmem:[#allocation8 + $0x244] sm:$0xf]  ;;  %v3152_v40 = vld [vmem:[#allocation8 + $0x258] sm:$0xf0] }
  0x5b   :  { %612 = vmatpush.bf16.msrb.mxu3 %v2763_v63  ;;  %v3534_v63 = vld [vmem:[#allocation8 + $0x540] sm:$0xf]  ;;  %v3319_v4 = vor.u32 %v4001_v60, %v3318_v59  ;;  %v3995_v45 = vld [vmem:[#allocation8 + $0x374] sm:$0xf0]  ;;  %v3896_v46 = vld [vmem:[#allocation8 + $0x64] sm:$0xf] }
  0x5c   :  { %574 = vmatpush.bf16.msrb.mxu0 %v2615_v6  ;;  %v3535_v3 = vor.u32 %v4055_v0, %v3534_v63  ;;  %v2886_v6 = vld [vmem:[#allocation8 + $0x30] sm:$0xf]  ;;  %v3294_v44 = vld [vmem:[#allocation8 + $0x360] sm:$0xf]  ;;  %v4049_v52 = vld [vmem:[#allocation8 + $0x524] sm:$0xf0] }
  0x5d   :  { %587 = vmatpush.bf16.msrb.mxu1 %v2743_v9  ;;  %v3078_v9 = vld [vmem:[#allocation8 + $0x1b0] sm:$0xf]  ;;  %v3295_v47 = vor.u32 %v3995_v45, %v3294_v44  ;;  %v3950_v53 = vld [vmem:[#allocation8 + $0x214] sm:$0xf]  ;;  %v3989_v59 = vld [vmem:[#allocation8 + $0x344] sm:$0xf0] }
  0x5e   :  { %600 = vmatpush.bf16.msrb.mxu2 %v2619_v10  ;;  %v3941_v10 = vld [vmem:[#allocation8 + $0x1c4] sm:$0xf0]  ;;  %v3510_v50 = vld [vmem:[#allocation8 + $0x510] sm:$0xf]  ;;  %v3890_v60 = vld [vmem:[#allocation8 + $0x34] sm:$0xf] }
  0x5f   :  { %613 = vmatpush.bf16.msrb.mxu3 %v2747_v11  ;;  %575 = vmatmul.bf16.vlgmr.msrb.gmra.mxu0 %v4387_v51  ;;  %v2887_v11 = vor.u32 %v3893_v7, %v2886_v6  ;;  %v3079_v15 = vor.u32 %v3941_v10, %v3078_v9  ;;  %v3270_v58 = vld [vmem:[#allocation8 + $0x330] sm:$0xf]  ;;  %v3486_v0 = vld [vmem:[#allocation8 + $0x4e0] sm:$0xf]  ;;  %v4043_v1 = vld [vmem:[#allocation8 + $0x4f4] sm:$0xf0] }
  0x60   :  { %1793 = vmatpush.bf16.msra.mxu0 %v3031_v12  ;;  %588 = vmatmul.bf16.vlgmr.msrb.gmra.mxu1 %v4389_v55  ;;  %v2862_v12 = vld [vmem:[#allocation8] sm:$0xf]  ;;  %v3271_v61 = vor.u32 %v3989_v59, %v3270_v58  ;;  %v3944_v2 = vld [vmem:[#allocation8 + $0x1e4] sm:$0xf]  ;;  %v3983_v7 = vld [vmem:[#allocation8 + $0x314] sm:$0xf0] }
  0x61   :  { %1806 = vmatpush.bf16.msra.mxu1 %v3223_v17  ;;  %601 = vmatmul.bf16.vlgmr.msrb.gmra.mxu2 %v4387_v51  ;;  %v3150_v51 = vld [vmem:[#allocation8 + $0x240] sm:$0xf]  ;;  %v3884_v9 = vld [vmem:[#allocation8 + $0x4] sm:$0xf]  ;;  %v2864_v10 = vld [vmem:[#allocation8 + $0x18] sm:$0xf0] }
  0x62   :  { %614 = vmatmul.bf16.vlgmr.msrb.gmra.mxu3 %v4389_v55  ;;  %1819 = vmatpush.bf16.msra.mxu2 %v3415_v20  ;;  %v2959_v55 = vor.u32 %v3911_v37, %v2958_v34  ;;  %v3151_v48 = vor.u32 %v3959_v41, %v3150_v51  ;;  %v3054_v17 = vld [vmem:[#allocation8 + $0x180] sm:$0xf]  ;;  %v3224_v20 = vld [vmem:[#allocation8 + $0x2e8] sm:$0xf0]  ;;  %v2960_v37 = vld [vmem:[#allocation8 + $0xd8] sm:$0xf0] }
  0x63   :  { %1832 = vmatpush.bf16.msra.mxu3 %v3607_v32  ;;  %v3055_v23 = vor.u32 %v3935_v18, %v3054_v17  ;;  %v3203_v32 = vor.u32 %v3968_v27, %v3200_v28  ;;  %v3176_v34 = vld [vmem:[#allocation8 + $0x288] sm:$0xf0]  ;;  %v2963_v51 = vor.u32 %v3908_v36, %v2960_v37  ;;  %v3902_v41 = vld [vmem:[#allocation8 + $0x94] sm:$0xf]  ;;  %v3246_v6 = vld [vmem:[#allocation8 + $0x300] sm:$0xf] }
  0x64   :  { %1794 = vmatpush.bf16.msra.mxu0 %v3007_v21  ;;  %v2863_v21 = vor.u32 %v3887_v13, %v2862_v12  ;;  %v2867_v12 = vor.u32 %v3884_v9, %v2864_v10  ;;  %v3416_v13 = vld [vmem:[#allocation8 + $0x468] sm:$0xf0]  ;;  %v4037_v16 = vld [vmem:[#allocation8 + $0x4c4] sm:$0xf0]  ;;  %v3938_v17 = vld [vmem:[#allocation8 + $0x1b4] sm:$0xf] }
  0x65   :  { %1807 = vmatpush.bf16.msra.mxu1 %v3199_v26  ;;  %v3227_v26 = vor.u32 %v3974_v19, %v3224_v20  ;;  %v3080_v19 = vld [vmem:[#allocation8 + $0x1c8] sm:$0xf0]  ;;  %v3438_v24 = vld [vmem:[#allocation8 + $0x480] sm:$0xf]  ;;  %v4031_v25 = vld [vmem:[#allocation8 + $0x494] sm:$0xf0] }
  0x66   :  { %1820 = vmatpush.bf16.msra.mxu2 %v3391_v31  ;;  %v2984_v31 = vld [vmem:[#allocation8 + $0x108] sm:$0xf0]  ;;  %v3083_v20 = vor.u32 %v3938_v17, %v3080_v19  ;;  %v3932_v27 = vld [vmem:[#allocation8 + $0x184] sm:$0xf]  ;;  %v3056_v28 = vld [vmem:[#allocation8 + $0x198] sm:$0xf0] }
  0x67   :  { %1833 = vmatpush.bf16.msra.mxu3 %v3583_v42  ;;  %v2987_v35 = vor.u32 %v3914_v30, %v2984_v31  ;;  %v2936_v42 = vld [vmem:[#allocation8 + $0xa8] sm:$0xf0]  ;;  %v3059_v30 = vor.u32 %v3932_v27, %v3056_v28  ;;  %v4064_v36 = vld [vmem:[#allocation8 + $0x5a4] sm:$0xf]  ;;  %v3584_v37 = vld [vmem:[#allocation8 + $0x5b8] sm:$0xf0] }
  0x68   :  { %1795 = vmatpush.bf16.msra.mxu0 %v2983_v33  ;;  %v3962_v33 = vld [vmem:[#allocation8 + $0x274] sm:$0xf]  ;;  %v3608_v31 = vld [vmem:[#allocation8 + $0x5e8] sm:$0xf0]  ;;  %v3248_v9 = vld [vmem:[#allocation8 + $0x318] sm:$0xf0] }
  0x69   :  { %1808 = vmatpush.bf16.msra.mxu1 %v3175_v38  ;;  %v3179_v38 = vor.u32 %v3962_v33, %v3176_v34  ;;  %v4010_v33 = vld [vmem:[#allocation8 + $0x3f4] sm:$0xf]  ;;  %v3368_v34 = vld [vmem:[#allocation8 + $0x408] sm:$0xf0]  ;;  %v3978_v27 = vld [vmem:[#allocation8 + $0x2ec] sm:$0xf0] }
  0x6a   :  { %1821 = vmatpush.bf16.msra.mxu2 %v3367_v43  ;;  %v3155_v43 = vor.u32 %v3956_v39, %v3152_v40  ;;  %v4004_v39 = vld [vmem:[#allocation8 + $0x3c4] sm:$0xf]  ;;  %v3344_v40 = vld [vmem:[#allocation8 + $0x3d8] sm:$0xf0]  ;;  %v3320_v44 = vld [vmem:[#allocation8 + $0x3a8] sm:$0xf0] }
  0x6b   :  { %1834 = vmatpush.bf16.msra.mxu3 %v3559_v54  ;;  %v3511_v54 = vor.u32 %v4049_v52, %v3510_v50  ;;  %v3992_v50 = vld [vmem:[#allocation8 + $0x364] sm:$0xf]  ;;  %v3296_v52 = vld [vmem:[#allocation8 + $0x378] sm:$0xf0]  ;;  %v4034_v17 = vld [vmem:[#allocation8 + $0x4b4] sm:$0xf] }
  0x6c   :  { %1796 = vmatpush.bf16.msra.mxu0 %v2959_v55  ;;  %v2939_v55 = vor.u32 %v3902_v41, %v2936_v42  ;;  %v4058_v41 = vld [vmem:[#allocation8 + $0x574] sm:$0xf]  ;;  %v3560_v42 = vld [vmem:[#allocation8 + $0x588] sm:$0xf0]  ;;  %v4028_v28 = vld [vmem:[#allocation8 + $0x484] sm:$0xf] }
  0x6d   :  { %1809 = vmatpush.bf16.msra.mxu1 %v3151_v48  ;;  %v2912_v48 = vld [vmem:[#allocation8 + $0x78] sm:$0xf0]  ;;  %s2591_s14 = sshll.u32 %s4467_s7, 4  ;;  %s2592_s14 = int_to_ptr.hbm [resolvable:$true] %s2591_s14 }
  0x6e   :  { %1822 = vmatpush.bf16.msra.mxu2 %v3343_v56  ;;  %v2915_v49 = vor.u32 %v3896_v46, %v2912_v48  ;;  %v3128_v56 = vld [vmem:[#allocation8 + $0x228] sm:$0xf0]  ;;  %v4399_v46 = vld [vmem:[#allocation7] sm:$0xf] }
  0x6f   :  { %1835 = vmatpush.bf16.msra.mxu3 %v3535_v3  ;;  %v3487_v3 = vor.u32 %v4043_v1, %v3486_v0  ;;  %v3536_v48 = vld [vmem:[#allocation8 + $0x558] sm:$0xf0]  ;;  %v4040_v1 = vld [vmem:[#allocation8 + $0x4e4] sm:$0xf] }
  0x70   :  { %1797 = vmatpush.bf16.msra.mxu0 %v2935_v57  ;;  %v3131_v57 = vor.u32 %v3950_v53, %v3128_v56  ;;  %v187_v53 = vperm.slane %v4399_v46, 0  ;;  %v4046_v56 = vld [vmem:[#allocation8 + $0x514] sm:$0xf] }
  0x71   :  { %1810 = vmatpush.bf16.msra.mxu1 %v3127_v62  ;;  %v2888_v62 = vld [vmem:[#allocation8 + $0x48] sm:$0xf0] }
  0x72   :  { %1823 = vmatpush.bf16.msra.mxu2 %v3319_v4  ;;  %v2891_v63 = vor.u32 %v3890_v60, %v2888_v62  ;;  %v3104_v4 = vld [vmem:[#allocation8 + $0x1f8] sm:$0xf0]  ;;  %v3986_v60 = vld [vmem:[#allocation8 + $0x334] sm:$0xf] }
  0x73   :  { %1836 = vmatpush.bf16.msra.mxu3 %v3511_v54  ;;  %v3299_v54 = vor.u32 %v3992_v50, %v3296_v52  ;;  %v3158_v50 = vld [vmem:[#allocation8 + $0x248] sm:$0xf]  ;;  %v3960_v52 = vld [vmem:[#allocation8 + $0x25c] sm:$0xf0] }
  0x74   :  { %1798 = vmatpush.bf16.msra.mxu0 %v2911_v5  ;;  %v3107_v5 = vor.u32 %v3944_v2, %v3104_v4  ;;  %v3488_v2 = vld [vmem:[#allocation8 + $0x4f8] sm:$0xf0]  ;;  %v3038_v4 = vld [vmem:[#allocation8 + $0x158] sm:$0xf] }
  0x75   :  { %1811 = vmatpush.bf16.msra.mxu1 %v3103_v8  ;;  %v3247_v8 = vor.u32 %v3983_v7, %v3246_v6  ;;  %v3491_v6 = vor.u32 %v4040_v1, %v3488_v2  ;;  %v188_v7 = vperm.slane %v4399_v46, 1 }
  0x76   :  { %1824 = vmatpush.bf16.msra.mxu2 %v3295_v47  ;;  %v4052_v47 = vld [vmem:[#allocation8 + $0x544] sm:$0xf] }
  0x77   :  { %1837 = vmatpush.bf16.msra.mxu3 %v3487_v3 }
  0x78   :  { %1799 = vmatpush.bf16.msra.mxu0 %v2887_v11  ;;  %v4022_v11 = vld [vmem:[#allocation8 + $0x454] sm:$0xf] }
  0x79   :  { %1812 = vmatpush.bf16.msra.mxu1 %v3079_v15  ;;  %v3419_v14 = vor.u32 %v4022_v11, %v3416_v13  ;;  %v3462_v15 = vld [vmem:[#allocation8 + $0x4b0] sm:$0xf]  ;;  %v3014_v13 = vld [vmem:[#allocation8 + $0x128] sm:$0xf] }
  0x7a   :  { %1825 = vmatpush.bf16.msra.mxu2 %v3271_v61  ;;  %v3463_v18 = vor.u32 %v4037_v16, %v3462_v15  ;;  %v3272_v61 = vld [vmem:[#allocation8 + $0x348] sm:$0xf0]  ;;  %v3924_v16 = vld [vmem:[#allocation8 + $0x13c] sm:$0xf0] }
  0x7b   :  { %v3275_v0 = vor.u32 %v3986_v60, %v3272_v61  ;;  %v3954_v60 = vld [vmem:[#allocation8 + $0x22c] sm:$0xf0]  ;;  %v2894_v61 = vld [vmem:[#allocation8 + $0x38] sm:$0xf] }
  0x7c   :  { %1800 = vmatpush.bf16.msra.mxu0 %v2863_v21  ;;  %v4016_v21 = vld [vmem:[#allocation8 + $0x424] sm:$0xf]  ;;  %1838 = vmatpush.bf16.msra.mxu3 %v3463_v18  ;;  %v3464_v18 = vld [vmem:[#allocation8 + $0x4c8] sm:$0xf0] }
  0x7d   :  { %1813 = vmatpush.bf16.msra.mxu1 %v3055_v23 }
  0x7e   :  { %1826 = vmatpush.bf16.msra.mxu2 %v3247_v8  ;;  %v3980_v8 = vld [vmem:[#allocation8 + $0x304] sm:$0xf] }
  0x7f   :  { %v3251_v11 = vor.u32 %v3980_v8, %v3248_v9  ;;  %v3422_v8 = vld [vmem:[#allocation8 + $0x458] sm:$0xf] }
  0x80   :  { %1845 = vmatpush.bf16.msrb.mxu0 %v3035_v22  ;;  %v3392_v22 = vld [vmem:[#allocation8 + $0x438] sm:$0xf0] }
  0x81   :  { %1858 = vmatpush.bf16.msrb.mxu1 %v3227_v26  ;;  %v3395_v23 = vor.u32 %v4016_v21, %v3392_v22  ;;  %v3439_v26 = vor.u32 %v4031_v25, %v3438_v24  ;;  %v3467_v22 = vor.u32 %v4034_v17, %v3464_v18  ;;  %v3086_v18 = vld [vmem:[#allocation8 + $0x1b8] sm:$0xf] }
  0x82   :  { %1871 = vmatpush.bf16.msrb.mxu2 %v3419_v14 }
  0x83   :  { %1839 = vmatpush.bf16.msra.mxu3 %v3439_v26  ;;  %v3015_v26 = vor.u32 %v3924_v16, %v3014_v13  ;;  %v190_v13 = vperm.slane %v4399_v46, 3 }
  0x84   :  { %1846 = vmatpush.bf16.msrb.mxu0 %v3011_v29  ;;  %v4070_v29 = vld [vmem:[#allocation8 + $0x5d4] sm:$0xf] }
  0x85   :  { %1859 = vmatpush.bf16.msrb.mxu1 %v3203_v32  ;;  %v3611_v32 = vor.u32 %v4070_v29, %v3608_v31  ;;  %v3440_v29 = vld [vmem:[#allocation8 + $0x498] sm:$0xf0]  ;;  %v3918_v31 = vld [vmem:[#allocation8 + $0x10c] sm:$0xf0] }
  0x86   :  { %1872 = vmatpush.bf16.msrb.mxu2 %v3395_v23  ;;  %v3230_v23 = vld [vmem:[#allocation8 + $0x2d8] sm:$0xf] }
  0x87   :  { %1884 = vmatpush.bf16.msrb.mxu3 %v3611_v32  ;;  %v3443_v32 = vor.u32 %v4028_v28, %v3440_v29 }
  0x88   :  { %1847 = vmatpush.bf16.msrb.mxu0 %v2987_v35  ;;  %v3371_v35 = vor.u32 %v4010_v33, %v3368_v34  ;;  %v3231_v34 = vor.u32 %v3978_v27, %v3230_v23  ;;  %v3016_v27 = vld [vmem:[#allocation8 + $0x140] sm:$0xf0] }
  0x89   :  { %1860 = vmatpush.bf16.msrb.mxu1 %v3179_v38  ;;  %v3587_v38 = vor.u32 %v4064_v36, %v3584_v37  ;;  %v3206_v37 = vld [vmem:[#allocation8 + $0x2a8] sm:$0xf] }
  0x8a   :  { %1873 = vmatpush.bf16.msrb.mxu2 %v3371_v35 }
  0x8b   :  { %1885 = vmatpush.bf16.msrb.mxu3 %v3587_v38  ;;  %v3972_v38 = vld [vmem:[#allocation8 + $0x2bc] sm:$0xf0] }
  0x8c   :  { %1848 = vmatpush.bf16.msrb.mxu0 %v2963_v51  ;;  %v3347_v51 = vor.u32 %v4004_v39, %v3344_v40  ;;  %v2966_v40 = vld [vmem:[#allocation8 + $0xc8] sm:$0xf] }
  0x8d   :  { %1861 = vmatpush.bf16.msrb.mxu1 %v3155_v43  ;;  %v3563_v43 = vor.u32 %v4058_v41, %v3560_v42  ;;  %v3207_v42 = vor.u32 %v3972_v38, %v3206_v37 }
  0x8e   :  { %1874 = vmatpush.bf16.msrb.mxu2 %v3347_v51  ;;  %v3912_v51 = vld [vmem:[#allocation8 + $0xdc] sm:$0xf0] }
  0x8f   :  { %1886 = vmatpush.bf16.msrb.mxu3 %v3563_v43  ;;  %v2967_v43 = vor.u32 %v3912_v51, %v2966_v40  ;;  %v3975_v40 = vld [vmem:[#allocation8 + $0x2dc] sm:$0xf]  ;;  %v3232_v51 = vld [vmem:[#allocation8 + $0x2f0] sm:$0xf0] }
  0x90   :  { %1849 = vmatpush.bf16.msrb.mxu0 %v2939_v55  ;;  %v3998_v55 = vld [vmem:[#allocation8 + $0x394] sm:$0xf] }
  0x91   :  { %1862 = vmatpush.bf16.msrb.mxu1 %v3131_v57  ;;  %v3323_v45 = vor.u32 %v3998_v55, %v3320_v44  ;;  %v3512_v57 = vld [vmem:[#allocation8 + $0x528] sm:$0xf0]  ;;  %v3182_v55 = vld [vmem:[#allocation8 + $0x278] sm:$0xf]  ;;  %v3966_v44 = vld [vmem:[#allocation8 + $0x28c] sm:$0xf0] }
  0x92   :  { %v3515_v58 = vor.u32 %v4046_v56, %v3512_v57  ;;  %v3159_v56 = vor.u32 %v3960_v52, %v3158_v50  ;;  %v189_v57 = vperm.slane %v4399_v46, 2  ;;  %v4068_v50 = vld [vmem:[#allocation8 + $0x5bc] sm:$0xf0] }
  0x93   :  { %1875 = vmatpush.bf16.msrb.mxu2 %v3323_v45  ;;  %v2942_v45 = vld [vmem:[#allocation8 + $0x98] sm:$0xf] }
  0x94   :  { %1850 = vmatpush.bf16.msrb.mxu0 %v2915_v49  ;;  %v3539_v49 = vor.u32 %v4052_v47, %v3536_v48  ;;  %v3906_v47 = vld [vmem:[#allocation8 + $0xac] sm:$0xf0]  ;;  %v3183_v48 = vor.u32 %v3966_v44, %v3182_v55  ;;  %v2992_v55 = vld [vmem:[#allocation8 + $0x110] sm:$0xf0] }
  0x95   :  { %1863 = vmatpush.bf16.msrb.mxu1 %v3107_v5  ;;  %v3930_v5 = vld [vmem:[#allocation8 + $0x16c] sm:$0xf0] }
  0x96   :  { %1887 = vmatpush.bf16.msrb.mxu3 %v3539_v49  ;;  %v2943_v49 = vor.u32 %v3906_v47, %v2942_v45 }
  0x97   :  { %1876 = vmatpush.bf16.msrb.mxu2 %v3299_v54  ;;  %v3900_v54 = vld [vmem:[#allocation8 + $0x7c] sm:$0xf0] }
  0x98   :  { %1851 = vmatpush.bf16.msrb.mxu0 %v2891_v63 }
  0x99   :  { %1864 = vmatpush.bf16.msrb.mxu1 %v3083_v20 }
  0x9a   :  { %1888 = vmatpush.bf16.msrb.mxu3 %v3515_v58 }
  0x9b   :  { %1877 = vmatpush.bf16.msrb.mxu2 %v3275_v0 }
  0x9c   :  { %1852 = vmatpush.bf16.msrb.mxu0 %v2867_v12  ;;  %v3039_v12 = vor.u32 %v3930_v5, %v3038_v4  ;;  %v3110_v4 = vld [vmem:[#allocation8 + $0x1e8] sm:$0xf]  ;;  %v3948_v5 = vld [vmem:[#allocation8 + $0x1fc] sm:$0xf0] }
  0x9d   :  { %1865 = vmatpush.bf16.msrb.mxu1 %v3059_v30  ;;  %v2990_v30 = vld [vmem:[#allocation8 + $0xf8] sm:$0xf] }
  0x9e   :  { %1889 = vmatpush.bf16.msrb.mxu3 %v3491_v6  ;;  %v2991_v36 = vor.u32 %v3918_v31, %v2990_v30  ;;  %v2870_v6 = vld [vmem:[#allocation8 + $0x8] sm:$0xf] }
  0x9f   :  { %1878 = vmatpush.bf16.msrb.mxu2 %v3251_v11  ;;  %v3927_v11 = vld [vmem:[#allocation8 + $0x15c] sm:$0xf]  ;;  %v3062_v31 = vld [vmem:[#allocation8 + $0x188] sm:$0xf] }
  0xa2   :  { %1890 = vmatpush.bf16.msrb.mxu3 %v3467_v22  ;;  %v3398_v22 = vld [vmem:[#allocation8 + $0x428] sm:$0xf] }
  0xa6   :  { %1891 = vmatpush.bf16.msrb.mxu3 %v3443_v32 }
  0xbc   :  { %v524_v59 = vpop.f32.mrf.mxu0 }
  0xbd   :  { %v525_v62 = vadd.f32 %v524_v59, %v187_v53  ;;  %v537_v63 = vpop.f32.mrf.mxu1  ;;  %v2918_v53 = vld [vmem:[#allocation8 + $0x68] sm:$0xf]  ;;  %v3134_v59 = vld [vmem:[#allocation8 + $0x218] sm:$0xf] }
  0xbe   :  { %v2919_v58 = vor.u32 %v3900_v54, %v2918_v53  ;;  %v3135_v0 = vor.u32 %v3954_v60, %v3134_v59  ;;  %v4008_v60 = vld [vmem:[#allocation8 + $0x3dc] sm:$0xf0] }
  0xbf   :  { %v538_v3 = vadd.f32 %v537_v63, %v525_v62  ;;  %v3894_v62 = vld [vmem:[#allocation8 + $0x4c] sm:$0xf0] }
  0xc1   :  { %v619_v10 = vmax.f32 %v538_v3, 0.0  ;;  %v2895_v3 = vor.u32 %v3894_v62, %v2894_v61  ;;  %v3909_v61 = vld [vmem:[#allocation8 + $0xcc] sm:$0xf]  ;;  %v2968_v62 = vld [vmem:[#allocation8 + $0xe0] sm:$0xf0] }
  0xc3   :  { %v4403_v14 = vpack.c.bf16 %v619_v10, %v619_v10  ;;  %v4026_v10 = vld [vmem:[#allocation8 + $0x46c] sm:$0xf0] }
  0xc4   :  { %v550_v15 = vpop.f32.mrf.mxu2  ;;  %v526_v21 = vpop.f32.mrf.mxu0 }
  0xc5   :  { %v551_v19 = vadd.f32 %v550_v15, %v188_v7  ;;  %v563_v20 = vpop.f32.mrf.mxu3  ;;  %1801 = vmatmul.bf16.vlgmr.msra.gmra.mxu0 %v4403_v14  ;;  %v539_v24 = vpop.f32.mrf.mxu1  ;;  %v3888_v7 = vld [vmem:[#allocation8 + $0x1c] sm:$0xf0]  ;;  %v3111_v15 = vor.u32 %v3948_v5, %v3110_v4  ;;  %v2971_v4 = vor.u32 %v3909_v61, %v2968_v62  ;;  %v4062_v5 = vld [vmem:[#allocation8 + $0x58c] sm:$0xf0]  ;;  %v3939_v61 = vld [vmem:[#allocation8 + $0x1bc] sm:$0xf] }
  0xc6   :  { %1897 = vmatpush.bf16.msra.mxu0 %v3039_v12  ;;  %v3040_v12 = vld [vmem:[#allocation8 + $0x170] sm:$0xf0]  ;;  %v2871_v17 = vor.u32 %v3888_v7, %v2870_v6  ;;  %v3963_v6 = vld [vmem:[#allocation8 + $0x27c] sm:$0xf] }
  0xc7   :  { %v564_v25 = vadd.f32 %v563_v20, %v551_v19  ;;  %v3942_v19 = vld [vmem:[#allocation8 + $0x1cc] sm:$0xf0]  ;;  %v3423_v20 = vor.u32 %v4026_v10, %v3422_v8  ;;  %v3043_v21 = vor.u32 %v3927_v11, %v3040_v12  ;;  %v3184_v7 = vld [vmem:[#allocation8 + $0x290] sm:$0xf0]  ;;  %v3903_v8 = vld [vmem:[#allocation8 + $0x9c] sm:$0xf] }
  0xc8   :  { %v3087_v46 = vor.u32 %v3942_v19, %v3086_v18  ;;  %v3326_v10 = vld [vmem:[#allocation8 + $0x398] sm:$0xf]  ;;  %v4002_v11 = vld [vmem:[#allocation8 + $0x3ac] sm:$0xf0]  ;;  %v3957_v18 = vld [vmem:[#allocation8 + $0x24c] sm:$0xf] }
  0xc9   :  { %v620_v33 = vmax.f32 %v564_v25, 0.0  ;;  %v4020_v25 = vld [vmem:[#allocation8 + $0x43c] sm:$0xf0]  ;;  %v3160_v19 = vld [vmem:[#allocation8 + $0x260] sm:$0xf0] }
  0xca   :  { %1898 = vmatpush.bf16.msra.mxu0 %v3015_v26  ;;  %v3921_v26 = vld [vmem:[#allocation8 + $0x12c] sm:$0xf]  ;;  %v3399_v38 = vor.u32 %v4020_v25, %v3398_v22  ;;  %v2920_v22 = vld [vmem:[#allocation8 + $0x80] sm:$0xf0]  ;;  %v3996_v25 = vld [vmem:[#allocation8 + $0x37c] sm:$0xf0] }
  0xcb   :  { %v4406_v35 = vpack.c.bf16 %v620_v33, %v620_v33  ;;  %v3936_v33 = vld [vmem:[#allocation8 + $0x19c] sm:$0xf0]  ;;  %v3088_v62 = vld [vmem:[#allocation8 + $0x1d0] sm:$0xf0] }
  0xcc   :  { %v552_v39 = vpop.f32.mrf.mxu2  ;;  %v3063_v45 = vor.u32 %v3936_v33, %v3062_v31  ;;  %v3136_v31 = vld [vmem:[#allocation8 + $0x230] sm:$0xf0]  ;;  %v3891_v33 = vld [vmem:[#allocation8 + $0x3c] sm:$0xf] }
  0xcd   :  { %1814 = vmatmul.bf16.vlgmr.msra.gmra.mxu1 %v4406_v35  ;;  %v565_v41 = vpop.f32.mrf.mxu3  ;;  %v3019_v39 = vor.u32 %v3921_v26, %v3016_v27  ;;  %v3163_v27 = vor.u32 %v3957_v18, %v3160_v19  ;;  %v2998_v19 = vld [vmem:[#allocation8 + $0x100] sm:$0xf] }
  0xce   :  { %1910 = vmatpush.bf16.msra.mxu1 %v3231_v34  ;;  %1899 = vmatpush.bf16.msra.mxu0 %v2991_v36  ;;  %v3614_v34 = vld [vmem:[#allocation8 + $0x5d8] sm:$0xf]  ;;  %v4074_v36 = vld [vmem:[#allocation8 + $0x5ec] sm:$0xf0] }
  0xcf   :  { %v3374_v41 = vld [vmem:[#allocation8 + $0x3f8] sm:$0xf]  ;;  %v3615_v47 = vor.u32 %v4074_v36, %v3614_v34  ;;  %v2896_v34 = vld [vmem:[#allocation8 + $0x50] sm:$0xf0] }
  0xd0   :  { %v3278_v36 = vld [vmem:[#allocation8 + $0x338] sm:$0xf] }
  0xd2   :  { %1911 = vmatpush.bf16.msra.mxu1 %v3207_v42  ;;  %1900 = vmatpush.bf16.msra.mxu0 %v2967_v43  ;;  %v4014_v42 = vld [vmem:[#allocation8 + $0x40c] sm:$0xf0]  ;;  %v3915_v43 = vld [vmem:[#allocation8 + $0xfc] sm:$0xf] }
  0xd3   :  { %v3375_v53 = vor.u32 %v4014_v42, %v3374_v41  ;;  %v2995_v54 = vor.u32 %v3915_v43, %v2992_v55  ;;  %v4044_v41 = vld [vmem:[#allocation8 + $0x4fc] sm:$0xf0]  ;;  %v3945_v42 = vld [vmem:[#allocation8 + $0x1ec] sm:$0xf]  ;;  %v3112_v43 = vld [vmem:[#allocation8 + $0x200] sm:$0xf0] }
  0xd5   :  { %1853 = vmatmul.bf16.vlgmr.msrb.gmra.mxu0 %v4403_v14 }
  0xd6   :  { %1912 = vmatpush.bf16.msra.mxu1 %v3183_v48  ;;  %1901 = vmatpush.bf16.msra.mxu0 %v2943_v49  ;;  %v3235_v48 = vor.u32 %v3975_v40, %v3232_v51  ;;  %v3590_v49 = vld [vmem:[#allocation8 + $0x5a8] sm:$0xf]  ;;  %v2899_v51 = vor.u32 %v3891_v33, %v2896_v34  ;;  %v2974_v33 = vld [vmem:[#allocation8 + $0xd0] sm:$0xf] }
  0xd7   :  { %v3494_v40 = vld [vmem:[#allocation8 + $0x4e8] sm:$0xf] }
  0xd8   :  { %v3913_v34 = vld [vmem:[#allocation8 + $0xe4] sm:$0xf0] }
  0xda   :  { %1913 = vmatpush.bf16.msra.mxu1 %v3159_v56  ;;  %1902 = vmatpush.bf16.msra.mxu0 %v2919_v58  ;;  %v3969_v56 = vld [vmem:[#allocation8 + $0x2ac] sm:$0xf]  ;;  %v3350_v58 = vld [vmem:[#allocation8 + $0x3c8] sm:$0xf] }
  0xdc   :  { %v576_v63 = vpop.f32.mrf.mxu0 }
  0xdd   :  { %v577_v1 = vadd.f32 %v576_v63, %v189_v57  ;;  %v589_v2 = vpop.f32.mrf.mxu1  ;;  %1866 = vmatmul.bf16.vlgmr.msrb.gmra.mxu1 %v4406_v35  ;;  %v3208_v57 = vld [vmem:[#allocation8 + $0x2c0] sm:$0xf0] }
  0xde   :  { %1914 = vmatpush.bf16.msra.mxu1 %v3135_v0  ;;  %1903 = vmatpush.bf16.msra.mxu0 %v2895_v3  ;;  %v3591_v0 = vor.u32 %v4068_v50, %v3590_v49  ;;  %v3351_v3 = vor.u32 %v4008_v60, %v3350_v58  ;;  %v3046_v49 = vld [vmem:[#allocation8 + $0x160] sm:$0xf]  ;;  %v3931_v50 = vld [vmem:[#allocation8 + $0x174] sm:$0xf0]  ;;  %v4038_v60 = vld [vmem:[#allocation8 + $0x4cc] sm:$0xf0] }
  0xdf   :  { %v590_v9 = vadd.f32 %v589_v2, %v577_v1  ;;  %v3211_v1 = vor.u32 %v3969_v56, %v3208_v57  ;;  %v3566_v2 = vld [vmem:[#allocation8 + $0x578] sm:$0xf]  ;;  %v4023_v56 = vld [vmem:[#allocation8 + $0x45c] sm:$0xf]  ;;  %v3424_v57 = vld [vmem:[#allocation8 + $0x470] sm:$0xf0] }
  0xe0   :  { %v3567_v12 = vor.u32 %v4062_v5, %v3566_v2  ;;  %v3470_v58 = vld [vmem:[#allocation8 + $0x4b8] sm:$0xf]  ;;  %v4017_v2 = vld [vmem:[#allocation8 + $0x42c] sm:$0xf] }
  0xe1   :  { %v621_v16 = vmax.f32 %v590_v9, 0.0  ;;  %v2944_v9 = vld [vmem:[#allocation8 + $0xb0] sm:$0xf0]  ;;  %v3471_v5 = vor.u32 %v4038_v60, %v3470_v58  ;;  %v3961_v58 = vld [vmem:[#allocation8 + $0x264] sm:$0xf0] }
  0xe2   :  { %1915 = vmatpush.bf16.msra.mxu1 %v3111_v15  ;;  %1904 = vmatpush.bf16.msra.mxu0 %v2871_v17  ;;  %v3542_v15 = vld [vmem:[#allocation8 + $0x548] sm:$0xf]  ;;  %v4056_v17 = vld [vmem:[#allocation8 + $0x55c] sm:$0xf0]  ;;  %v2926_v60 = vld [vmem:[#allocation8 + $0x70] sm:$0xf] }
  0xe3   :  { %v4413_v23 = vpack.c.bf16 %v621_v16, %v621_v16  ;;  %v2947_v16 = vor.u32 %v3903_v8, %v2944_v9  ;;  %v3543_v26 = vor.u32 %v4056_v17, %v3542_v15  ;;  %v3446_v8 = vld [vmem:[#allocation8 + $0x488] sm:$0xf]  ;;  %v4032_v9 = vld [vmem:[#allocation8 + $0x49c] sm:$0xf0]  ;;  %v3616_v15 = vld [vmem:[#allocation8 + $0x5f0] sm:$0xf0] }
  0xe4   :  { %v602_v24 = vpop.f32.mrf.mxu2  ;;  %v578_v30 = vpop.f32.mrf.mxu0  ;;  %v3979_v17 = vld [vmem:[#allocation8 + $0x2f4] sm:$0xf0] }
  0xe5   :  { %v603_v28 = vadd.f32 %v602_v24, %v190_v13  ;;  %v615_v29 = vpop.f32.mrf.mxu3  ;;  %v591_v32 = vpop.f32.mrf.mxu1  ;;  %1827 = vmatmul.bf16.vlgmr.msra.gmra.mxu2 %v4413_v23  ;;  %1905 = vmatmul.bf16.vlgmr.msra.gmra.mxu0 %v4403_v14  ;;  %v3187_v13 = vor.u32 %v3963_v6, %v3184_v7  ;;  %v3302_v24 = vld [vmem:[#allocation8 + $0x368] sm:$0xf]  ;;  %v4050_v30 = vld [vmem:[#allocation8 + $0x52c] sm:$0xf0]  ;;  %v3091_v6 = vor.u32 %v3939_v61, %v3088_v62  ;;  %v3400_v7 = vld [vmem:[#allocation8 + $0x440] sm:$0xf0] }
  0xe6   :  { %1923 = vmatpush.bf16.msra.mxu2 %v3423_v20  ;;  %1949 = vmatpush.bf16.msrb.mxu0 %v3043_v21  ;;  %v3327_v20 = vor.u32 %v4002_v11, %v3326_v10  ;;  %v3897_v21 = vld [vmem:[#allocation8 + $0x6c] sm:$0xf]  ;;  %v3303_v32 = vor.u32 %v3996_v25, %v3302_v24  ;;  %v3064_v11 = vld [vmem:[#allocation8 + $0x1a0] sm:$0xf0]  ;;  %v3403_v18 = vor.u32 %v4017_v2, %v3400_v7  ;;  %v4011_v24 = vld [vmem:[#allocation8 + $0x3fc] sm:$0xf] }
  0xe7   :  { %v616_v37 = vadd.f32 %v615_v29, %v603_v28  ;;  %1916 = vmatpush.bf16.msra.mxu1 %v3087_v46  ;;  %v3518_v28 = vld [vmem:[#allocation8 + $0x518] sm:$0xf]  ;;  %v2923_v29 = vor.u32 %v3897_v21, %v2920_v22  ;;  %v3951_v46 = vld [vmem:[#allocation8 + $0x21c] sm:$0xf]  ;;  %v3933_v10 = vld [vmem:[#allocation8 + $0x18c] sm:$0xf]  ;;  %v3447_v21 = vor.u32 %v4032_v9, %v3446_v8 }
  0xe8   :  { %v3067_v22 = vor.u32 %v3933_v10, %v3064_v11  ;;  %v3376_v25 = vld [vmem:[#allocation8 + $0x410] sm:$0xf0]  ;;  %v3901_v61 = vld [vmem:[#allocation8 + $0x84] sm:$0xf0]  ;;  %v3993_v62 = vld [vmem:[#allocation8 + $0x36c] sm:$0xf] }
  0xe9   :  { %v622_v44 = vmax.f32 %v616_v37, 0.0  ;;  %v3990_v37 = vld [vmem:[#allocation8 + $0x34c] sm:$0xf0]  ;;  %v4047_v2 = vld [vmem:[#allocation8 + $0x51c] sm:$0xf] }
  0xea   :  { %1924 = vmatpush.bf16.msra.mxu2 %v3399_v38  ;;  %1950 = vmatpush.bf16.msrb.mxu0 %v3019_v39  ;;  %v3519_v38 = vor.u32 %v4050_v30, %v3518_v28  ;;  %v3139_v39 = vor.u32 %v3951_v46, %v3136_v31  ;;  %v3279_v55 = vor.u32 %v3990_v37, %v3278_v36  ;;  %v4065_v28 = vld [vmem:[#allocation8 + $0x5ac] sm:$0xf]  ;;  %v3592_v30 = vld [vmem:[#allocation8 + $0x5c0] sm:$0xf0]  ;;  %v3214_v46 = vld [vmem:[#allocation8 + $0x2b0] sm:$0xf] }
  0xeb   :  { %v4417_v52 = vpack.c.bf16 %v622_v44, %v622_v44  ;;  %1917 = vmatpush.bf16.msra.mxu1 %v3063_v45  ;;  %v3254_v44 = vld [vmem:[#allocation8 + $0x308] sm:$0xf]  ;;  %v3885_v45 = vld [vmem:[#allocation8 + $0xc] sm:$0xf]  ;;  %v3352_v37 = vld [vmem:[#allocation8 + $0x3e0] sm:$0xf0] }
  0xec   :  { %v604_v59 = vpop.f32.mrf.mxu2  ;;  %v3973_v31 = vld [vmem:[#allocation8 + $0x2c4] sm:$0xf0]  ;;  %v4005_v36 = vld [vmem:[#allocation8 + $0x3cc] sm:$0xf]  ;;  %v2902_v8 = vld [vmem:[#allocation8 + $0x40] sm:$0xf] }
  0xed   :  { %v617_v63 = vpop.f32.mrf.mxu3  ;;  %1840 = vmatmul.bf16.vlgmr.msra.gmra.mxu3 %v4417_v52  ;;  %v3895_v9 = vld [vmem:[#allocation8 + $0x54] sm:$0xf0]  ;;  %v3987_v10 = vld [vmem:[#allocation8 + $0x33c] sm:$0xf]  ;;  %v3280_v11 = vld [vmem:[#allocation8 + $0x350] sm:$0xf0] }
  0xee   :  { %1936 = vmatpush.bf16.msra.mxu3 %v3615_v47  ;;  %1925 = vmatpush.bf16.msra.mxu2 %v3375_v53  ;;  %v2872_v47 = vld [vmem:[#allocation8 + $0x20] sm:$0xf0]  ;;  %v3495_v53 = vor.u32 %v4044_v41, %v3494_v40  ;;  %v4059_v40 = vld [vmem:[#allocation8 + $0x57c] sm:$0xf]  ;;  %v3568_v41 = vld [vmem:[#allocation8 + $0x590] sm:$0xf0] }
  0xef   :  { %1962 = vmatpush.bf16.msrb.mxu1 %v3235_v48  ;;  %1951 = vmatpush.bf16.msrb.mxu0 %v2995_v54  ;;  %v3984_v48 = vld [vmem:[#allocation8 + $0x31c] sm:$0xf0]  ;;  %v3115_v54 = vor.u32 %v3945_v42, %v3112_v43  ;;  %v2875_v59 = vor.u32 %v3885_v45, %v2872_v47  ;;  %v3967_v43 = vld [vmem:[#allocation8 + $0x294] sm:$0xf0]  ;;  %v3999_v47 = vld [vmem:[#allocation8 + $0x39c] sm:$0xf] }
  0xf0   :  { %1918 = vmatmul.bf16.vlgmr.msra.gmra.mxu1 %v4406_v35  ;;  %v3255_v63 = vor.u32 %v3984_v48, %v3254_v44  ;;  %v3190_v42 = vld [vmem:[#allocation8 + $0x280] sm:$0xf]  ;;  %v3907_v45 = vld [vmem:[#allocation8 + $0xb4] sm:$0xf0]  ;;  %v3328_v48 = vld [vmem:[#allocation8 + $0x3b0] sm:$0xf0] }
  0xf1   :  { %v2950_v44 = vld [vmem:[#allocation8 + $0xa0] sm:$0xf] }
  0xf2   :  { %1937 = vmatpush.bf16.msra.mxu3 %v3591_v0  ;;  %1926 = vmatpush.bf16.msra.mxu2 %v3351_v3  ;;  %v3047_v0 = vor.u32 %v3931_v50, %v3046_v49  ;;  %v3022_v3 = vld [vmem:[#allocation8 + $0x130] sm:$0xf]  ;;  %v3571_v49 = vor.u32 %v4059_v40, %v3568_v41  ;;  %v3191_v50 = vor.u32 %v3967_v43, %v3190_v42  ;;  %v3024_v41 = vld [vmem:[#allocation8 + $0x148] sm:$0xf0] }
  0xf3   :  { %1963 = vmatpush.bf16.msrb.mxu1 %v3211_v1  ;;  %1952 = vmatpush.bf16.msrb.mxu0 %v2971_v4  ;;  %v3427_v1 = vor.u32 %v4023_v56, %v3424_v57  ;;  %v3925_v4 = vld [vmem:[#allocation8 + $0x144] sm:$0xf0]  ;;  %v3544_v56 = vld [vmem:[#allocation8 + $0x560] sm:$0xf0]  ;;  %v3166_v57 = vld [vmem:[#allocation8 + $0x250] sm:$0xf] }
  0xf4   :  { %v3406_v40 = vld [vmem:[#allocation8 + $0x430] sm:$0xf] }
  0xf5   :  { %1879 = vmatmul.bf16.vlgmr.msrb.gmra.mxu2 %v4413_v23 }
  0xf6   :  { %1938 = vmatpush.bf16.msra.mxu3 %v3567_v12  ;;  %1927 = vmatpush.bf16.msra.mxu2 %v3327_v20  ;;  %v4071_v12 = vld [vmem:[#allocation8 + $0x5dc] sm:$0xf]  ;;  %v3919_v20 = vld [vmem:[#allocation8 + $0x114] sm:$0xf0] }
  0xf7   :  { %1964 = vmatpush.bf16.msrb.mxu1 %v3187_v13  ;;  %1953 = vmatpush.bf16.msrb.mxu0 %v2947_v16  ;;  %v3023_v13 = vor.u32 %v3925_v4, %v3022_v3  ;;  %v3238_v16 = vld [vmem:[#allocation8 + $0x2e0] sm:$0xf]  ;;  %v2927_v3 = vor.u32 %v3901_v61, %v2926_v60  ;;  %v3520_v4 = vld [vmem:[#allocation8 + $0x530] sm:$0xf0] }
  0xfa   :  { %1939 = vmatpush.bf16.msra.mxu3 %v3543_v26  ;;  %1928 = vmatpush.bf16.msra.mxu2 %v3303_v32  ;;  %v3619_v26 = vor.u32 %v4071_v12, %v3616_v15  ;;  %v3379_v32 = vor.u32 %v4011_v24, %v3376_v25  ;;  %v3523_v12 = vor.u32 %v4047_v2, %v3520_v4  ;;  %v4041_v15 = vld [vmem:[#allocation8 + $0x4ec] sm:$0xf]  ;;  %v3889_v24 = vld [vmem:[#allocation8 + $0x24] sm:$0xf0]  ;;  %v3256_v25 = vld [vmem:[#allocation8 + $0x320] sm:$0xf0] }
  0xfb   :  { %1965 = vmatpush.bf16.msrb.mxu1 %v3163_v27  ;;  %1954 = vmatpush.bf16.msrb.mxu0 %v2923_v29  ;;  %v3239_v27 = vor.u32 %v3979_v17, %v3238_v16  ;;  %v2999_v29 = vor.u32 %v3919_v20, %v2998_v19  ;;  %v2903_v16 = vor.u32 %v3895_v9, %v2902_v8  ;;  %v3496_v17 = vld [vmem:[#allocation8 + $0x500] sm:$0xf0]  ;;  %v3949_v19 = vld [vmem:[#allocation8 + $0x204] sm:$0xf0]  ;;  %v3598_v2 = vld [vmem:[#allocation8 + $0x5b0] sm:$0xf] }
  0xfc   :  { %v3283_v20 = vor.u32 %v3987_v10, %v3280_v11  ;;  %v4069_v4 = vld [vmem:[#allocation8 + $0x5c4] sm:$0xf0]  ;;  %v2976_v8 = vld [vmem:[#allocation8 + $0xe8] sm:$0xf0] }
  0xfd   :  { %1892 = vmatmul.bf16.vlgmr.msrb.gmra.mxu3 %v4417_v52  ;;  %v3599_v10 = vor.u32 %v4069_v4, %v3598_v2  ;;  %v4024_v2 = vld [vmem:[#allocation8 + $0x464] sm:$0xf]  ;;  %v3432_v4 = vld [vmem:[#allocation8 + $0x478] sm:$0xf0] }
  0xfe   :  { %1940 = vmatpush.bf16.msra.mxu3 %v3519_v38  ;;  %1929 = vmatpush.bf16.msra.mxu2 %v3279_v55  ;;  %v3595_v38 = vor.u32 %v4065_v28, %v3592_v30  ;;  %v3355_v55 = vor.u32 %v4005_v36, %v3352_v37  ;;  %v3499_v28 = vor.u32 %v4041_v15, %v3496_v17  ;;  %v3430_v30 = vld [vmem:[#allocation8 + $0x460] sm:$0xf]  ;;  %v3943_v36 = vld [vmem:[#allocation8 + $0x1d4] sm:$0xf0] }
  0xff   :  { %1966 = vmatpush.bf16.msrb.mxu1 %v3139_v39  ;;  %1955 = vmatpush.bf16.msrb.mxu0 %v2899_v51  ;;  %v3215_v39 = vor.u32 %v3973_v31, %v3214_v46  ;;  %v2975_v51 = vor.u32 %v3913_v34, %v2974_v33  ;;  %v4027_v46 = vld [vmem:[#allocation8 + $0x474] sm:$0xf0]  ;;  %v4035_v31 = vld [vmem:[#allocation8 + $0x4bc] sm:$0xf]  ;;  %v3472_v33 = vld [vmem:[#allocation8 + $0x4d0] sm:$0xf0] }
 0x100   :  { %v3094_v34 = vld [vmem:[#allocation8 + $0x1c0] sm:$0xf]  ;;  %v3475_v42 = vor.u32 %v4035_v31, %v3472_v33  ;;  %v4063_v17 = vld [vmem:[#allocation8 + $0x594] sm:$0xf0]  ;;  %v3168_v31 = vld [vmem:[#allocation8 + $0x268] sm:$0xf0] }
 0x101   :  { %v3095_v43 = vor.u32 %v3943_v36, %v3094_v34  ;;  %v3574_v15 = vld [vmem:[#allocation8 + $0x580] sm:$0xf]  ;;  %v2928_v33 = vld [vmem:[#allocation8 + $0x88] sm:$0xf0] }
 0x102   :  { %1941 = vmatpush.bf16.msra.mxu3 %v3495_v53  ;;  %1930 = vmatpush.bf16.msra.mxu2 %v3255_v63  ;;  %v4053_v53 = vld [vmem:[#allocation8 + $0x54c] sm:$0xf]  ;;  %v3304_v63 = vld [vmem:[#allocation8 + $0x380] sm:$0xf0] }
 0x103   :  { %1967 = vmatpush.bf16.msrb.mxu1 %v3115_v54  ;;  %1956 = vmatpush.bf16.msrb.mxu0 %v2875_v59  ;;  %v2951_v54 = vor.u32 %v3907_v45, %v2950_v44  ;;  %v3331_v59 = vor.u32 %v3999_v47, %v3328_v48  ;;  %v3307_v7 = vor.u32 %v3993_v62, %v3304_v63  ;;  %v4029_v44 = vld [vmem:[#allocation8 + $0x48c] sm:$0xf]  ;;  %v3448_v45 = vld [vmem:[#allocation8 + $0x4a0] sm:$0xf0]  ;;  %v3070_v47 = vld [vmem:[#allocation8 + $0x190] sm:$0xf] }
 0x104   :  { %v3937_v48 = vld [vmem:[#allocation8 + $0x1a4] sm:$0xf0]  ;;  %v3451_v60 = vor.u32 %v4029_v44, %v3448_v45  ;;  %v2904_v44 = vld [vmem:[#allocation8 + $0x58] sm:$0xf0] }
 0x105   :  { %1931 = vmatmul.bf16.vlgmr.msra.gmra.mxu2 %v4413_v23  ;;  %v3071_v61 = vor.u32 %v3937_v48, %v3070_v47 }
 0x106   :  { %1975 = vmatpush.bf16.msrb.mxu2 %v3427_v1  ;;  %1942 = vmatpush.bf16.msra.mxu3 %v3471_v5  ;;  %v3167_v1 = vor.u32 %v3961_v58, %v3166_v57  ;;  %v3142_v5 = vld [vmem:[#allocation8 + $0x220] sm:$0xf]  ;;  %v3916_v58 = vld [vmem:[#allocation8 + $0x104] sm:$0xf] }
 0x107   :  { %2001 = vmatpush.bf16.msra.mxu0 %v3047_v0  ;;  %1968 = vmatpush.bf16.msrb.mxu1 %v3091_v6  ;;  %v3547_v0 = vor.u32 %v4053_v53, %v3544_v56  ;;  %v3955_v6 = vld [vmem:[#allocation8 + $0x234] sm:$0xf0]  ;;  %v3240_v56 = vld [vmem:[#allocation8 + $0x2f8] sm:$0xf0] }
 0x108   :  { %1957 = vmatmul.bf16.vlgmr.msrb.gmra.mxu0 %v4403_v14  ;;  %v4075_v53 = vld [vmem:[#allocation8 + $0x5f4] sm:$0xf0] }
 0x10a   :  { %1976 = vmatpush.bf16.msrb.mxu2 %v3403_v18  ;;  %1943 = vmatpush.bf16.msra.mxu3 %v3447_v21  ;;  %v3118_v18 = vld [vmem:[#allocation8 + $0x1f0] sm:$0xf]  ;;  %v3981_v21 = vld [vmem:[#allocation8 + $0x30c] sm:$0xf] }
 0x10b   :  { %2002 = vmatpush.bf16.msra.mxu0 %v3023_v13  ;;  %1969 = vmatpush.bf16.msrb.mxu1 %v3067_v22  ;;  %v3143_v13 = vor.u32 %v3955_v6, %v3142_v5  ;;  %v2878_v22 = vld [vmem:[#allocation8 + $0x10] sm:$0xf]  ;;  %v3259_v37 = vor.u32 %v3981_v21, %v3256_v25  ;;  %v3970_v5 = vld [vmem:[#allocation8 + $0x2b4] sm:$0xf]  ;;  %v3216_v6 = vld [vmem:[#allocation8 + $0x2c8] sm:$0xf0] }
 0x10c   :  { %v3219_v11 = vor.u32 %v3970_v5, %v3216_v6  ;;  %v2952_v21 = vld [vmem:[#allocation8 + $0xb8] sm:$0xf0]  ;;  %v3478_v5 = vld [vmem:[#allocation8 + $0x4c0] sm:$0xf]  ;;  %v4039_v6 = vld [vmem:[#allocation8 + $0x4d4] sm:$0xf0] }
 0x10d   :  { %1944 = vmatmul.bf16.vlgmr.msra.gmra.mxu3 %v4417_v52 }
 0x10e   :  { %1988 = vmatpush.bf16.msrb.mxu3 %v3619_v26  ;;  %1970 = vmatmul.bf16.vlgmr.msrb.gmra.mxu1 %v4406_v35  ;;  %v3928_v26 = vld [vmem:[#allocation8 + $0x164] sm:$0xf] }
 0x10f   :  { %2014 = vmatpush.bf16.msra.mxu1 %v3239_v27  ;;  %2003 = vmatpush.bf16.msra.mxu0 %v2999_v29  ;;  %v3048_v27 = vld [vmem:[#allocation8 + $0x178] sm:$0xf0]  ;;  %v3119_v29 = vor.u32 %v3949_v19, %v3118_v18  ;;  %v3964_v18 = vld [vmem:[#allocation8 + $0x284] sm:$0xf] }
 0x110   :  { %1977 = vmatpush.bf16.msrb.mxu2 %v3379_v32  ;;  %v2879_v32 = vor.u32 %v3889_v24, %v2878_v22  ;;  %v3192_v19 = vld [vmem:[#allocation8 + $0x298] sm:$0xf0]  ;;  %v3575_v24 = vor.u32 %v4063_v17, %v3574_v15  ;;  %v3408_v15 = vld [vmem:[#allocation8 + $0x448] sm:$0xf0] }
 0x111   :  { %v3195_v25 = vor.u32 %v3964_v18, %v3192_v19  ;;  %v4033_v18 = vld [vmem:[#allocation8 + $0x4a4] sm:$0xf0]  ;;  %v3934_v19 = vld [vmem:[#allocation8 + $0x194] sm:$0xf] }
 0x112   :  { %1989 = vmatpush.bf16.msrb.mxu3 %v3595_v38  ;;  %v3051_v38 = vor.u32 %v3928_v26, %v3048_v27  ;;  %v3334_v26 = vld [vmem:[#allocation8 + $0x3a0] sm:$0xf]  ;;  %v4003_v27 = vld [vmem:[#allocation8 + $0x3b4] sm:$0xf0] }
 0x113   :  { %2015 = vmatpush.bf16.msra.mxu1 %v3215_v39  ;;  %2004 = vmatpush.bf16.msra.mxu0 %v2975_v51  ;;  %v3431_v39 = vor.u32 %v4027_v46, %v3430_v30  ;;  %v3922_v51 = vld [vmem:[#allocation8 + $0x134] sm:$0xf]  ;;  %v4057_v30 = vld [vmem:[#allocation8 + $0x564] sm:$0xf0]  ;;  %v3335_v34 = vor.u32 %v4003_v27, %v3334_v26 }
 0x114   :  { %1978 = vmatpush.bf16.msrb.mxu2 %v3355_v55  ;;  %v4021_v55 = vld [vmem:[#allocation8 + $0x444] sm:$0xf0]  ;;  %v3958_v46 = vld [vmem:[#allocation8 + $0x254] sm:$0xf] }
 0x115   :  { %v3407_v57 = vor.u32 %v4021_v55, %v3406_v40  ;;  %v3526_v40 = vld [vmem:[#allocation8 + $0x520] sm:$0xf]  ;;  %v3892_v55 = vld [vmem:[#allocation8 + $0x44] sm:$0xf] }
 0x116   :  { %1990 = vmatpush.bf16.msrb.mxu3 %v3571_v49  ;;  %v3622_v49 = vld [vmem:[#allocation8 + $0x5e0] sm:$0xf] }
 0x117   :  { %2016 = vmatpush.bf16.msra.mxu1 %v3191_v50  ;;  %2005 = vmatpush.bf16.msra.mxu0 %v2951_v54  ;;  %v3027_v50 = vor.u32 %v3922_v51, %v3024_v41  ;;  %v3976_v54 = vld [vmem:[#allocation8 + $0x2e4] sm:$0xf]  ;;  %v3623_v62 = vor.u32 %v4075_v53, %v3622_v49  ;;  %v4051_v41 = vld [vmem:[#allocation8 + $0x534] sm:$0xf0]  ;;  %v3286_v49 = vld [vmem:[#allocation8 + $0x340] sm:$0xf] }
 0x118   :  { %1979 = vmatpush.bf16.msrb.mxu2 %v3331_v59  ;;  %v3000_v59 = vld [vmem:[#allocation8 + $0x118] sm:$0xf0]  ;;  %v3243_v63 = vor.u32 %v3976_v54, %v3240_v56  ;;  %v3527_v47 = vor.u32 %v4051_v41, %v3526_v40  ;;  %v3502_v53 = vld [vmem:[#allocation8 + $0x4f0] sm:$0xf]  ;;  %v2907_v54 = vor.u32 %v3892_v55, %v2904_v44  ;;  %v4045_v56 = vld [vmem:[#allocation8 + $0x504] sm:$0xf0] }
 0x119   :  { %v4080_v40 = vld [vmem:[#allocation11 + $0x20] sm:$0xff]  ;;  %v3336_v55 = vld [vmem:[#allocation8 + $0x3b8] sm:$0xf0]  ;;  %v4054_v44 = vld [vmem:[#allocation8 + $0x554] sm:$0xf] }
 0x11a   :  { %1991 = vmatpush.bf16.msrb.mxu3 %v3547_v0  ;;  %v3382_v0 = vld [vmem:[#allocation8 + $0x400] sm:$0xf] }
 0x11b   :  { %2017 = vmatpush.bf16.msra.mxu1 %v3167_v1  ;;  %2006 = vmatpush.bf16.msra.mxu0 %v2927_v3  ;;  %v4015_v1 = vld [vmem:[#allocation8 + $0x414] sm:$0xf0]  ;;  %v3003_v3 = vor.u32 %v3916_v58, %v3000_v59  ;;  %v3120_v58 = vld [vmem:[#allocation8 + $0x208] sm:$0xf0]  ;;  %v3886_v59 = vld [vmem:[#allocation8 + $0x14] sm:$0xf] }
 0x11c   :  { %1980 = vmatpush.bf16.msrb.mxu2 %v3307_v7  ;;  %v3910_v7 = vld [vmem:[#allocation8 + $0xd4] sm:$0xf]  ;;  %v3383_v9 = vor.u32 %v4015_v1, %v3382_v0  ;;  %v3262_v0 = vld [vmem:[#allocation8 + $0x310] sm:$0xf]  ;;  %v3985_v1 = vld [vmem:[#allocation8 + $0x324] sm:$0xf0] }
 0x11e   :  { %1992 = vmatpush.bf16.msrb.mxu3 %v3523_v12  ;;  %v3358_v12 = vld [vmem:[#allocation8 + $0x3d0] sm:$0xf] }
 0x11f   :  { %2018 = vmatpush.bf16.msra.mxu1 %v3143_v13  ;;  %2007 = vmatpush.bf16.msra.mxu0 %v2903_v16  ;;  %v4009_v13 = vld [vmem:[#allocation8 + $0x3e4] sm:$0xf0]  ;;  %v2979_v16 = vor.u32 %v3910_v7, %v2976_v8  ;;  %v3940_v7 = vld [vmem:[#allocation8 + $0x1c4] sm:$0xf]  ;;  %v3096_v8 = vld [vmem:[#allocation8 + $0x1d8] sm:$0xf0] }
 0x120   :  { %1981 = vmatpush.bf16.msrb.mxu2 %v3283_v20  ;;  %v3904_v20 = vld [vmem:[#allocation8 + $0xa4] sm:$0xf]  ;;  %v3359_v22 = vor.u32 %v4009_v13, %v3358_v12  ;;  %v3479_v12 = vor.u32 %v4039_v6, %v3478_v5  ;;  %v4018_v13 = vld [vmem:[#allocation8 + $0x434] sm:$0xf]  ;;  %v3099_v17 = vor.u32 %v3940_v7, %v3096_v8 }
 0x121   :  { %v4088_v5 = vld [vmem:[#allocation11 + $0x60] sm:$0xff]  ;;  %v3982_v8 = vld [vmem:[#allocation8 + $0x314] sm:$0xf] }
 0x122   :  { %1993 = vmatpush.bf16.msrb.mxu3 %v3499_v28  ;;  %v3550_v28 = vld [vmem:[#allocation8 + $0x550] sm:$0xf] }
 0x123   :  { %2019 = vmatpush.bf16.msra.mxu1 %v3119_v29  ;;  %2008 = vmatpush.bf16.msra.mxu0 %v2879_v32  ;;  %v2955_v29 = vor.u32 %v3904_v20, %v2952_v21  ;;  %v3898_v32 = vld [vmem:[#allocation8 + $0x74] sm:$0xf]  ;;  %v3551_v36 = vor.u32 %v4057_v30, %v3550_v28  ;;  %v3072_v20 = vld [vmem:[#allocation8 + $0x1a8] sm:$0xf0]  ;;  %v4072_v21 = vld [vmem:[#allocation8 + $0x5e4] sm:$0xf] }
 0x124   :  { %1982 = vmatpush.bf16.msrb.mxu2 %v3259_v37  ;;  %v3171_v37 = vor.u32 %v3958_v46, %v3168_v31  ;;  %v2931_v51 = vor.u32 %v3898_v32, %v2928_v33  ;;  %v3075_v27 = vor.u32 %v3934_v19, %v3072_v20  ;;  %v3384_v30 = vld [vmem:[#allocation8 + $0x418] sm:$0xf0]  ;;  %v4066_v46 = vld [vmem:[#allocation8 + $0x5b4] sm:$0xf]  ;;  %v3600_v31 = vld [vmem:[#allocation8 + $0x5c8] sm:$0xf0] }
 0x125   :  { %v4081_v32 = vld [vmem:[#allocation11 + $0x28] sm:$0xff] }
 0x126   :  { %1994 = vmatpush.bf16.msrb.mxu3 %v3475_v42  ;;  %2009 = vmatmul.bf16.vlgmr.msra.gmra.mxu0 %v4403_v14  ;;  %v3952_v42 = vld [vmem:[#allocation8 + $0x224] sm:$0xf]  ;;  %v4030_v19 = vld [vmem:[#allocation8 + $0x494] sm:$0xf]  ;;  %v3456_v20 = vld [vmem:[#allocation8 + $0x4a8] sm:$0xf0] }
 0x127   :  { %2053 = vmatpush.bf16.msrb.mxu0 %v3051_v38  ;;  %2020 = vmatpush.bf16.msra.mxu1 %v3095_v43  ;;  %v3310_v38 = vld [vmem:[#allocation8 + $0x370] sm:$0xf]  ;;  %v3144_v43 = vld [vmem:[#allocation8 + $0x238] sm:$0xf0] }
 0x128   :  { %2027 = vmatpush.bf16.msra.mxu2 %v3431_v39  ;;  %v3997_v39 = vld [vmem:[#allocation8 + $0x384] sm:$0xf0]  ;;  %v3147_v48 = vor.u32 %v3952_v42, %v3144_v43  ;;  %v4000_v43 = vld [vmem:[#allocation8 + $0x3a4] sm:$0xf] }
 0x129   :  { %1983 = vmatmul.bf16.vlgmr.msrb.gmra.mxu2 %v4413_v23  ;;  %v3311_v45 = vor.u32 %v3997_v39, %v3310_v38  ;;  %v3576_v39 = vld [vmem:[#allocation8 + $0x598] sm:$0xf0] }
 0x12a   :  { %1995 = vmatpush.bf16.msrb.mxu3 %v3451_v60  ;;  %v2880_v60 = vld [vmem:[#allocation8 + $0x28] sm:$0xf0] }
 0x12b   :  { %2054 = vmatpush.bf16.msrb.mxu0 %v3027_v50  ;;  %2021 = vmatpush.bf16.msra.mxu1 %v3071_v61  ;;  %v3991_v50 = vld [vmem:[#allocation8 + $0x354] sm:$0xf0] }
 0x12c   :  { %2028 = vmatpush.bf16.msra.mxu2 %v3407_v57  ;;  %v3946_v57 = vld [vmem:[#allocation8 + $0x1f4] sm:$0xf]  ;;  %v3287_v61 = vor.u32 %v3991_v50, %v3286_v49  ;;  %v3339_v49 = vor.u32 %v4000_v43, %v3336_v55 }
 0x12d   :  { %1996 = vmatmul.bf16.vlgmr.msrb.gmra.mxu3 %v4417_v52  ;;  %v4093_v43 = vld [vmem:[#allocation11 + $0x88] sm:$0xff] }
 0x12e   :  { %2040 = vmatpush.bf16.msra.mxu3 %v3623_v62  ;;  %2022 = vmatmul.bf16.vlgmr.msra.gmra.mxu1 %v4406_v35  ;;  %v3503_v62 = vor.u32 %v4045_v56, %v3502_v53 }
 0x12f   :  { %2066 = vmatpush.bf16.msrb.mxu1 %v3243_v63  ;;  %2055 = vmatpush.bf16.msrb.mxu0 %v3003_v3  ;;  %v3123_v63 = vor.u32 %v3946_v57, %v3120_v58  ;;  %v2883_v3 = vor.u32 %v3886_v59, %v2880_v60  ;;  %v4048_v57 = vld [vmem:[#allocation8 + $0x524] sm:$0xf]  ;;  %v3528_v58 = vld [vmem:[#allocation8 + $0x538] sm:$0xf0] }
 0x130   :  { %2029 = vmatpush.bf16.msra.mxu2 %v3383_v9  ;;  %v4083_v9 = vld [vmem:[#allocation11 + $0x38] sm:$0xff]  ;;  %v4078_v59 = vld [vmem:[#allocation11 + $0x10] sm:$0xff] }
 0x132   :  { %2041 = vmatpush.bf16.msra.mxu3 %v3599_v10  ;;  %v3263_v10 = vor.u32 %v3985_v1, %v3262_v0  ;;  %v3288_v0 = vld [vmem:[#allocation8 + $0x358] sm:$0xf0]  ;;  %v4042_v1 = vld [vmem:[#allocation8 + $0x4f4] sm:$0xf] }
 0x133   :  { %2067 = vmatpush.bf16.msrb.mxu1 %v3219_v11  ;;  %2056 = vmatpush.bf16.msrb.mxu0 %v2979_v16  ;;  %v3435_v11 = vor.u32 %v4024_v2, %v3432_v4  ;;  %v3454_v16 = vld [vmem:[#allocation8 + $0x490] sm:$0xf]  ;;  %v3504_v2 = vld [vmem:[#allocation8 + $0x508] sm:$0xf0] }
 0x134   :  { %2030 = vmatpush.bf16.msra.mxu2 %v3359_v22  ;;  %v3624_v22 = vld [vmem:[#allocation8 + $0x5f8] sm:$0xf0]  ;;  %v3455_v26 = vor.u32 %v4033_v18, %v3454_v16  ;;  %v3507_v7 = vor.u32 %v4042_v1, %v3504_v2 }
 0x135   :  { %v3627_v28 = vor.u32 %v4072_v21, %v3624_v22  ;;  %v4087_v16 = vld [vmem:[#allocation11 + $0x58] sm:$0xff]  ;;  %v4086_v21 = vld [vmem:[#allocation11 + $0x50] sm:$0xff] }
 0x136   :  { %2042 = vmatpush.bf16.msra.mxu3 %v3575_v24  ;;  %v4082_v24 = vld [vmem:[#allocation11 + $0x30] sm:$0xff]  ;;  %v4099_v18 = vld [vmem:[#allocation11 + $0xb8] sm:$0xff] }
 0x137   :  { %2068 = vmatpush.bf16.msrb.mxu1 %v3195_v25  ;;  %2057 = vmatpush.bf16.msrb.mxu0 %v2955_v29  ;;  %v3411_v25 = vor.u32 %v4018_v13, %v3408_v15  ;;  %v4012_v29 = vld [vmem:[#allocation8 + $0x404] sm:$0xf] }
 0x138   :  { %2031 = vmatpush.bf16.msra.mxu2 %v3335_v34  ;;  %v3387_v33 = vor.u32 %v4012_v29, %v3384_v30  ;;  %v3603_v34 = vor.u32 %v4066_v46, %v3600_v31  ;;  %v4076_v13 = vld [vmem:[#allocation11] sm:$0xff]  ;;  %v4442_v29 = vld [vmem:[#allocation10] sm:$0x3f] }
 0x139   :  { %v4084_v30 = vld [vmem:[#allocation11 + $0x40] sm:$0xff]  ;;  %v821_v46 = vperm.slane %v4442_v29, 0  ;;  %v823_v2 = vperm.slane %v4442_v29, 2 }
 0x13a   :  { %2043 = vmatpush.bf16.msra.mxu3 %v3551_v36  ;;  %v4006_v36 = vld [vmem:[#allocation8 + $0x3d4] sm:$0xf] }
 0x13b   :  { %2069 = vmatpush.bf16.msrb.mxu1 %v3171_v37  ;;  %2058 = vmatpush.bf16.msrb.mxu0 %v2931_v51  ;;  %v3360_v37 = vld [vmem:[#allocation8 + $0x3e8] sm:$0xf0]  ;;  %v4091_v51 = vld [vmem:[#allocation11 + $0x78] sm:$0xff] }
 0x13c   :  { %2032 = vmatpush.bf16.msra.mxu2 %v3311_v45  ;;  %v3363_v41 = vor.u32 %v4006_v36, %v3360_v37  ;;  %v3552_v45 = vld [vmem:[#allocation8 + $0x568] sm:$0xf0]  ;;  %v4095_v36 = vld [vmem:[#allocation11 + $0x98] sm:$0xff] }
 0x13d   :  { %v3555_v53 = vor.u32 %v4054_v44, %v3552_v45  ;;  %v4107_v44 = vld [vmem:[#allocation11 + $0xf8] sm:$0xff] }
 0x13e   :  { %2044 = vmatpush.bf16.msra.mxu3 %v3527_v47  ;;  %v4079_v47 = vld [vmem:[#allocation11 + $0x18] sm:$0xff] }
 0x13f   :  { %2070 = vmatpush.bf16.msrb.mxu1 %v3147_v48  ;;  %2059 = vmatpush.bf16.msrb.mxu0 %v2907_v54  ;;  %v4090_v48 = vld [vmem:[#allocation11 + $0x70] sm:$0xff] }
 0x140   :  { %2033 = vmatpush.bf16.msra.mxu2 %v3287_v61  ;;  %v3994_v54 = vld [vmem:[#allocation8 + $0x374] sm:$0xf] }
 0x141   :  { %v4089_v61 = vld [vmem:[#allocation11 + $0x68] sm:$0xff] }
 0x142   :  { %2045 = vmatpush.bf16.msra.mxu3 %v3503_v62  ;;  %v4433_v38 = vpop.f32.mrf.mxu0  ;;  %v3531_v62 = vor.u32 %v4048_v57, %v3528_v58 }
 0x143   :  { %2071 = vmatpush.bf16.msrb.mxu1 %v3123_v63  ;;  %2060 = vmatpush.bf16.msrb.mxu0 %v2883_v3  ;;  %v3988_v63 = vld [vmem:[#allocation8 + $0x344] sm:$0xf]  ;;  %v4077_v3 = vld [vmem:[#allocation11 + $0x8] sm:$0xff] }
 0x144   :  { %2034 = vmatpush.bf16.msra.mxu2 %v3263_v10  ;;  %v3291_v4 = vor.u32 %v3988_v63, %v3288_v0 }
 0x146   :  { %2046 = vmatpush.bf16.msra.mxu3 %v3479_v12  ;;  %2061 = vmatmul.bf16.vlgmr.msrb.gmra.mxu0 %v4403_v14  ;;  %v4060_v14 = vld [vmem:[#allocation8 + $0x584] sm:$0xf]  ;;  %v3480_v12 = vld [vmem:[#allocation8 + $0x4d8] sm:$0xf0] }
 0x147   :  { %2505 = vmatpush.bf16.msra.mxu0 %v4083_v9  ;;  %2072 = vmatpush.bf16.msrb.mxu1 %v3099_v17  ;;  %v3579_v42 = vor.u32 %v4060_v14, %v3576_v39  ;;  %v3264_v9 = vld [vmem:[#allocation8 + $0x328] sm:$0xf0]  ;;  %v4094_v39 = vld [vmem:[#allocation11 + $0x90] sm:$0xff] }
 0x148   :  { %2079 = vmatpush.bf16.msrb.mxu2 %v3435_v11  ;;  %v4036_v11 = vld [vmem:[#allocation8 + $0x4c4] sm:$0xf]  ;;  %v3267_v15 = vor.u32 %v3982_v8, %v3264_v9  ;;  %v4101_v9 = vld [vmem:[#allocation11 + $0xc8] sm:$0xff] }
 0x149   :  { %2035 = vmatmul.bf16.vlgmr.msra.gmra.mxu2 %v4413_v23  ;;  %v3483_v17 = vor.u32 %v4036_v11, %v3480_v12  ;;  %v4100_v12 = vld [vmem:[#allocation11 + $0xc0] sm:$0xff] }
 0x14a   :  { %2047 = vmatpush.bf16.msra.mxu3 %v3455_v26  ;;  %v4437_v50 = vpop.f32.mrf.mxu1  ;;  %v1804_v56 = vpop.f32.mrf.mxu0 }
 0x14b   :  { %2506 = vmatpush.bf16.msra.mxu0 %v4082_v24  ;;  %2073 = vmatpush.bf16.msrb.mxu1 %v3075_v27  ;;  %v3459_v24 = vor.u32 %v4030_v19, %v3456_v20  ;;  %v4085_v27 = vld [vmem:[#allocation11 + $0x48] sm:$0xff]  ;;  %v4114_v20 = vld [vmem:[#allocation11 + $0x130] sm:$0xff] }
 0x14c   :  { %2080 = vmatpush.bf16.msrb.mxu2 %v3411_v25  ;;  %v4098_v25 = vld [vmem:[#allocation11 + $0xb0] sm:$0xff] }
 0x14d   :  { %2048 = vmatmul.bf16.vlgmr.msra.gmra.mxu3 %v4417_v52 }
 0x14e   :  { %2092 = vmatpush.bf16.msrb.mxu3 %v3627_v28  ;;  %2074 = vmatmul.bf16.vlgmr.msrb.gmra.mxu1 %v4406_v35  ;;  %v3312_v35 = vld [vmem:[#allocation8 + $0x388] sm:$0xf0] }
 0x14f   :  { %2507 = vmatpush.bf16.msra.mxu0 %v4081_v32  ;;  %2518 = vmatpush.bf16.msra.mxu1 %v4091_v51  ;;  %v3315_v60 = vor.u32 %v3994_v54, %v3312_v35  ;;  %v4097_v28 = vld [vmem:[#allocation11 + $0xa8] sm:$0xff]  ;;  %v4096_v32 = vld [vmem:[#allocation11 + $0xa0] sm:$0xff] }
 0x150   :  { %2081 = vmatpush.bf16.msrb.mxu2 %v3387_v33  ;;  %v4105_v54 = vld [vmem:[#allocation11 + $0xe8] sm:$0xff] }
 0x152   :  { %2093 = vmatpush.bf16.msrb.mxu3 %v3603_v34  ;;  %v1817_v6 = vpop.f32.mrf.mxu1  ;;  %v4439_v10 = vpop.f32.mrf.mxu0  ;;  %v1803_v34 = vadd.f32 %v4433_v38, %v821_v46  ;;  %v4092_v38 = vld [vmem:[#allocation11 + $0x80] sm:$0xff] }
 0x153   :  { %2508 = vmatpush.bf16.msra.mxu0 %v4080_v40  ;;  %2519 = vmatpush.bf16.msra.mxu1 %v4090_v48  ;;  %v822_v48 = vperm.slane %v4442_v29, 1 }
 0x154   :  { %2082 = vmatpush.bf16.msrb.mxu2 %v3363_v41  ;;  %v1816_v37 = vadd.f32 %v4437_v50, %v1803_v34  ;;  %v4106_v50 = vld [vmem:[#allocation11 + $0xf0] sm:$0xff]  ;;  %v4109_v34 = vld [vmem:[#allocation11 + $0x108] sm:$0xff] }
 0x155   :  { %v1855_v35 = vadd.f32 %v4439_v10, %v822_v48  ;;  %v825_v48 = vperm.slane %v4442_v29, 4 }
 0x156   :  { %2094 = vmatpush.bf16.msrb.mxu3 %v3579_v42 }
 0x157   :  { %2509 = vmatpush.bf16.msra.mxu0 %v4079_v47  ;;  %2520 = vmatpush.bf16.msra.mxu1 %v4089_v61 }
 0x158   :  { %2083 = vmatpush.bf16.msrb.mxu2 %v3339_v49 }
 0x15a   :  { %2095 = vmatpush.bf16.msrb.mxu3 %v3555_v53  ;;  %v1867_v22 = vpop.f32.mrf.mxu1  ;;  %v1856_v26 = vpop.f32.mrf.mxu0 }
 0x15b   :  { %2510 = vmatpush.bf16.msra.mxu0 %v4078_v59  ;;  %2521 = vmatpush.bf16.msra.mxu1 %v4088_v5  ;;  %v1868_v56 = vadd.f32 %v1867_v22, %v1855_v35  ;;  %v4104_v59 = vld [vmem:[#allocation11 + $0xe0] sm:$0xff]  ;;  %v4113_v22 = vld [vmem:[#allocation11 + $0x128] sm:$0xff]  ;;  %v4111_v26 = vld [vmem:[#allocation11 + $0x118] sm:$0xff] }
 0x15c   :  { %2084 = vmatpush.bf16.msrb.mxu2 %v3315_v60 }
 0x15e   :  { %2096 = vmatpush.bf16.msrb.mxu3 %v3531_v62  ;;  %v4103_v62 = vld [vmem:[#allocation11 + $0xd8] sm:$0xff] }
 0x15f   :  { %2511 = vmatpush.bf16.msra.mxu0 %v4077_v3  ;;  %2522 = vmatpush.bf16.msra.mxu1 %v4087_v16 }
 0x160   :  { %2085 = vmatpush.bf16.msrb.mxu2 %v3291_v4  ;;  %v4102_v4 = vld [vmem:[#allocation11 + $0xd0] sm:$0xff] }
 0x162   :  { %2097 = vmatpush.bf16.msrb.mxu3 %v3507_v7  ;;  %v1869_v31 = vpop.f32.mrf.mxu1  ;;  %v1906_v33 = vpop.f32.mrf.mxu0 }
 0x163   :  { %2512 = vmatpush.bf16.msra.mxu0 %v4076_v13  ;;  %2523 = vmatpush.bf16.msra.mxu1 %v4086_v21  ;;  %v1907_v7 = vadd.f32 %v1906_v33, %v823_v2 }
 0x164   :  { %2086 = vmatpush.bf16.msrb.mxu2 %v3267_v15  ;;  %v4115_v15 = vld [vmem:[#allocation11 + $0x138] sm:$0xff] }
 0x166   :  { %2098 = vmatpush.bf16.msrb.mxu3 %v3483_v17 }
 0x167   :  { %2087 = vmatmul.bf16.vlgmr.msrb.gmra.mxu2 %v4413_v23  ;;  %2524 = vmatpush.bf16.msra.mxu1 %v4085_v27 }
 0x168   :  { %2531 = vmatpush.bf16.msra.mxu2 %v4099_v18  ;;  %v1828_v23 = vpop.f32.mrf.mxu2  ;;  %2557 = vmatpush.bf16.msrb.mxu0 %v4115_v15 }
 0x16a   :  { %2099 = vmatpush.bf16.msrb.mxu3 %v3459_v24  ;;  %v1908_v40 = vpop.f32.mrf.mxu0 }
 0x16b   :  { %2525 = vmatpush.bf16.msra.mxu1 %v4084_v30  ;;  %v4110_v30 = vld [vmem:[#allocation11 + $0x110] sm:$0xff]  ;;  %v4123_v40 = vld [vmem:[#allocation11 + $0x178] sm:$0xff] }
 0x16c   :  { %2532 = vmatpush.bf16.msra.mxu2 %v4098_v25  ;;  %2558 = vmatpush.bf16.msrb.mxu0 %v4114_v20  ;;  %v4112_v25 = vld [vmem:[#allocation11 + $0x120] sm:$0xff] }
 0x16d   :  { %2100 = vmatmul.bf16.vlgmr.msrb.gmra.mxu3 %v4417_v52  ;;  %v1919_v14 = vpop.f32.mrf.mxu1  ;;  %v1829_v52 = vadd.f32 %v1828_v23, %v1816_v37 }
 0x16e   :  { %2544 = vmatpush.bf16.msra.mxu3 %v4107_v44  ;;  %v1920_v10 = vadd.f32 %v1919_v14, %v1907_v7  ;;  %v4108_v14 = vld [vmem:[#allocation11 + $0x100] sm:$0xff] }
 0x16f   :  { %2570 = vmatpush.bf16.msrb.mxu1 %v4123_v40 }
 0x170   :  { %2533 = vmatpush.bf16.msra.mxu2 %v4097_v28  ;;  %v1841_v51 = vpop.f32.mrf.mxu3  ;;  %v1830_v42 = vpop.f32.mrf.mxu2  ;;  %2559 = vmatpush.bf16.msrb.mxu0 %v4113_v22  ;;  %v824_v28 = vperm.slane %v4442_v29, 3 }
 0x171   :  { %v1842_v41 = vadd.f32 %v1841_v51, %v1829_v52 }
 0x172   :  { %2545 = vmatpush.bf16.msra.mxu3 %v4106_v50 }
 0x173   :  { %v2105_v55 = vmax.f32 %v1842_v41, 0.0 }
 0x174   :  { %2534 = vmatpush.bf16.msra.mxu2 %v4096_v32  ;;  %2560 = vmatpush.bf16.msrb.mxu0 %v4112_v25 }
 0x175   :  { %v2111_v45 = vpack.c.bf16 %v2105_v55, %v2105_v55  ;;  %v1921_v47 = vpop.f32.mrf.mxu1  ;;  %v4121_v55 = vld [vmem:[#allocation11 + $0x168] sm:$0xff] }
 0x176   :  { %2546 = vmatpush.bf16.msra.mxu3 %v4105_v54  ;;  %v4119_v47 = vld [vmem:[#allocation11 + $0x158] sm:$0xff] }
 0x177   :  { %2513 = vmatmul.bf16.vlgmr.msra.gmra.mxu0 %v2111_v45  ;;  %v4120_v45 = vld [vmem:[#allocation11 + $0x160] sm:$0xff] }
 0x178   :  { %2535 = vmatpush.bf16.msra.mxu2 %v4095_v36  ;;  %v1843_v49 = vpop.f32.mrf.mxu3  ;;  %v1880_v53 = vpop.f32.mrf.mxu2  ;;  %2561 = vmatpush.bf16.msrb.mxu0 %v4111_v26 }
 0x179   :  { %v1881_v57 = vadd.f32 %v1880_v53, %v1868_v56  ;;  %v4118_v49 = vld [vmem:[#allocation11 + $0x150] sm:$0xff]  ;;  %v4117_v56 = vld [vmem:[#allocation11 + $0x148] sm:$0xff] }
 0x17a   :  { %2547 = vmatpush.bf16.msra.mxu3 %v4104_v59 }
 0x17c   :  { %2536 = vmatpush.bf16.msra.mxu2 %v4094_v39  ;;  %2562 = vmatpush.bf16.msrb.mxu0 %v4110_v30 }
 0x17e   :  { %2548 = vmatpush.bf16.msra.mxu3 %v4103_v62 }
 0x180   :  { %2537 = vmatpush.bf16.msra.mxu2 %v4093_v43  ;;  %v1893_v58 = vpop.f32.mrf.mxu3  ;;  %v1882_v61 = vpop.f32.mrf.mxu2  ;;  %2563 = vmatpush.bf16.msrb.mxu0 %v4109_v34  ;;  %v4122_v43 = vld [vmem:[#allocation11 + $0x170] sm:$0xff] }
 0x181   :  { %v1894_v60 = vadd.f32 %v1893_v58, %v1881_v57  ;;  %2571 = vmatpush.bf16.msrb.mxu1 %v4122_v43 }
 0x182   :  { %2549 = vmatpush.bf16.msra.mxu3 %v4102_v4 }
 0x183   :  { %v2106_v63 = vmax.f32 %v1894_v60, 0.0  ;;  %v4116_v60 = vld [vmem:[#allocation11 + $0x140] sm:$0xff] }
 0x184   :  { %2538 = vmatpush.bf16.msra.mxu2 %v4092_v38  ;;  %2564 = vmatpush.bf16.msrb.mxu0 %v4108_v14 }
 0x185   :  { %v1958_v0 = vpop.f32.mrf.mxu0  ;;  %v2112_v1 = vpack.c.bf16 %v2106_v63, %v2106_v63  ;;  %2572 = vmatpush.bf16.msrb.mxu1 %v4121_v55 }
 0x186   :  { %2550 = vmatpush.bf16.msra.mxu3 %v4101_v9  ;;  %v1959_v32 = vadd.f32 %v1958_v0, %v824_v28 }
 0x187   :  { %2526 = vmatmul.bf16.vlgmr.msra.gmra.mxu1 %v2112_v1 }
 0x188   :  { %v1895_v3 = vpop.f32.mrf.mxu3  ;;  %v1932_v6 = vpop.f32.mrf.mxu2 }
 0x189   :  { %v1933_v11 = vadd.f32 %v1932_v6, %v1920_v10  ;;  %2573 = vmatpush.bf16.msrb.mxu1 %v4120_v45  ;;  %v826_v3 = vperm.slane %v4442_v29, 5 }
 0x18a   :  { %2551 = vmatpush.bf16.msra.mxu3 %v4100_v12 }
 0x18b   :  { %v1971_v5 = vpop.f32.mrf.mxu1 }
 0x18c   :  { %v1972_v23 = vadd.f32 %v1971_v5, %v1959_v32 }
 0x18d   :  { %v1960_v8 = vpop.f32.mrf.mxu0  ;;  %2574 = vmatpush.bf16.msrb.mxu1 %v4119_v47 }
 0x190   :  { %v1945_v13 = vpop.f32.mrf.mxu3  ;;  %v1934_v18 = vpop.f32.mrf.mxu2 }
 0x191   :  { %v1946_v16 = vadd.f32 %v1945_v13, %v1933_v11  ;;  %2575 = vmatpush.bf16.msrb.mxu1 %v4118_v49 }
 0x193   :  { %v1973_v17 = vpop.f32.mrf.mxu1  ;;  %v2107_v19 = vmax.f32 %v1946_v16, 0.0 }
 0x194   :  { %v4137_v17 = vld [vmem:[%s4466_s6] ss:$0 sm:$0xff] }
 0x195   :  { %v2113_v21 = vpack.c.bf16 %v2107_v19, %v2107_v19  ;;  %2576 = vmatpush.bf16.msrb.mxu1 %v4117_v56 }
 0x197   :  { %2539 = vmatmul.bf16.vlgmr.msra.gmra.mxu2 %v2113_v21 }
 0x198   :  { %v1947_v24 = vpop.f32.mrf.mxu3 }
 0x199   :  { %2577 = vmatpush.bf16.msrb.mxu1 %v4116_v60 }
 0x1a3   :  { %v2010_v27 = vpop.f32.mrf.mxu0 }
 0x1a4   :  { %v2011_v50 = vadd.f32 %v2010_v27, %v825_v48 }
 0x1ab   :  { %v2023_v31 = vpop.f32.mrf.mxu1  ;;  %v2012_v33 = vpop.f32.mrf.mxu0 }
 0x1ac   :  { %v1984_v46 = vpop.f32.mrf.mxu2  ;;  %v2024_v57 = vadd.f32 %v2023_v31, %v2011_v50 }
 0x1ad   :  { %v1985_v36 = vadd.f32 %v1984_v46, %v1972_v23 }
 0x1b0   :  { %v1997_v37 = vpop.f32.mrf.mxu3 }
 0x1b1   :  { %v1998_v39 = vadd.f32 %v1997_v37, %v1985_v36 }
 0x1b3   :  { %v2025_v51 = vpop.f32.mrf.mxu1  ;;  %v2108_v41 = vmax.f32 %v1998_v39, 0.0 }
 0x1b4   :  { %v1986_v52 = vpop.f32.mrf.mxu2 }
 0x1b5   :  { %v2114_v42 = vpack.c.bf16 %v2108_v41, %v2108_v41 }
 0x1b7   :  { %2552 = vmatmul.bf16.vlgmr.msra.gmra.mxu3 %v2114_v42 }
 0x1b8   :  { %v1999_v44 = vpop.f32.mrf.mxu3 }
 0x1c3   :  { %v2062_v38 = vpop.f32.mrf.mxu0 }
 0x1c4   :  { %v2063_v4 = vadd.f32 %v2062_v38, %v826_v3 }
 0x1cb   :  { %v2075_v54 = vpop.f32.mrf.mxu1  ;;  %v2064_v35 = vpop.f32.mrf.mxu0 }
 0x1cc   :  { %v2036_v53 = vpop.f32.mrf.mxu2  ;;  %v2076_v6 = vadd.f32 %v2075_v54, %v2063_v4 }
 0x1cd   :  { %v2037_v58 = vadd.f32 %v2036_v53, %v2024_v57 }
 0x1d0   :  { %v2049_v59 = vpop.f32.mrf.mxu3 }
 0x1d1   :  { %v2050_v61 = vadd.f32 %v2049_v59, %v2037_v58 }
 0x1d3   :  { %v2109_v62 = vmax.f32 %v2050_v61, 0.0  ;;  %v2077_v0 = vpop.f32.mrf.mxu1 }
 0x1d4   :  { %v2038_v63 = vpop.f32.mrf.mxu2 }
 0x1d5   :  { %v2115_v1 = vpack.c.bf16 %v2109_v62, %v2109_v62 }
 0x1d7   :  { %2565 = vmatmul.bf16.vlgmr.msrb.gmra.mxu0 %v2115_v1 }
 0x1d8   :  { %v2051_v2 = vpop.f32.mrf.mxu3 }
 0x1ea   :  { %v2088_v5 = vpop.f32.mrf.mxu2 }
 0x1eb   :  { %v2089_v7 = vadd.f32 %v2088_v5, %v2076_v6 }
 0x1f0   :  { %v2101_v8 = vpop.f32.mrf.mxu3 }
 0x1f1   :  { %v2102_v9 = vadd.f32 %v2101_v8, %v2089_v7 }
 0x1f2   :  { %v2090_v11 = vpop.f32.mrf.mxu2 }
 0x1f3   :  { %v2110_v10 = vmax.f32 %v2102_v9, 0.0 }
 0x1f4   :  { %v2514_v15 = vpop.f32.mrf.mxu0 }
 0x1f5   :  { %v2116_v12 = vpack.c.bf16 %v2110_v10, %v2110_v10  ;;  %v2515_v18 = vadd.f32 %v4137_v17, %v2514_v15 }
 0x1f7   :  { %2578 = vmatmul.bf16.vlgmr.msrb.gmra.mxu1 %v2116_v12 }
 0x1f8   :  { %v2103_v13 = vpop.f32.mrf.mxu3 }
 0x1fc   :  { %v2516_v16 = vpop.f32.mrf.mxu0 }
 0x204   :  { %v2527_v19 = vpop.f32.mrf.mxu1 }
 0x205   :  { %v2528_v29 = vadd.f32 %v2527_v19, %v2515_v18 }
 0x20c   :  { %v2529_v20 = vpop.f32.mrf.mxu1 }
 0x21a   :  { %v2540_v21 = vpop.f32.mrf.mxu2 }
 0x21b   :  { %v2541_v22 = vadd.f32 %v2540_v21, %v2528_v29 }
 0x222   :  { %v2542_v24 = vpop.f32.mrf.mxu2 }
 0x23a   :  { %v2553_v25 = vpop.f32.mrf.mxu3 }
 0x23b   :  { %v2554_v30 = vadd.f32 %v2553_v25, %v2541_v22 }
 0x242   :  { %v2555_v26 = vpop.f32.mrf.mxu3 }
 0x254   :  { %v2566_v27 = vpop.f32.mrf.mxu0 }
 0x255   :  { %v2567_v46 = vadd.f32 %v2566_v27, %v2554_v30 }
 0x25c   :  { %v2568_v28 = vpop.f32.mrf.mxu0 }
 0x274   :  { %v2579_v31 = vpop.f32.mrf.mxu1 }
 0x275   :  { %v2580_v32 = vadd.f32 %v2579_v31, %v2567_v46 }
 0x277   :  { %2583 = vst [vmem:[#allocation13] sm:$0xff] %v2580_v32 }
 0x278   :  { %2594 = dma.vmem_to_hbm [thread:$0]  %s2590_s11, 128, %s2592_s14, [#allocation4]  }
 0x27c   :  { %v2581_v33 = vpop.f32.mrf.mxu1 }
 0x27d   :  { %4314 = dma.done.wait [#allocation4], 128  }
 0x27e   :  { %4315 = vsyncadd [#allocation4], 4294967168 }
 0x27f   :  { %2599 = vsyncpa [#allocation3], 1 }
 0x280   :  { %2600 = vsyncpa [#allocation6], 1 }
 0x281   :  { %2601 = vsyncpa [#allocation9], 1 }
 0x282   :  { %2602 = vsyncpa [#allocation12], 1 }
 0x283   :  { %2603 = vsyncpa [#allocation4], 1 }

</bundles_post_ra>
